<compile_context>
chip_gen: v6e
topology: v6e:2x2x1
jax: 0.10.0
libtpu: 0.0.40
codegen_flags: <defaults>
</compile_context>

<pallas_src>
import functools
import math

import jax
import jax.numpy as jnp
import numpy as np
from jax import lax
from jax.experimental import pallas as pl
from jax.experimental.pallas import tpu as pltpu

# ----------------------------- configuration -------------------------------
B = 2            # batch
S = 8            # sequence length (unmasked patches)
D = 32           # enc_embed_dim
NUM_HEADS = 4    # num_enc_attention_heads
HEAD_DIM = D // NUM_HEADS
MLP_DIM = 4 * D  # enc_mlp_layer_dim == 4 * enc_embed_dim
LN_EPS = 1e-5    # enc_layer_norm_eps (PyTorch LayerNorm default)


def _dot(a, b, mm_dtype):
    # Cast only the matmul operands (no-op for f32); accumulate in f32 on MXU.
    return jnp.dot(a.astype(mm_dtype), b.astype(mm_dtype),
                   preferred_element_type=jnp.float32)


# ------------------------------ fused kernel --------------------------------
def _encoder_layer_kernel(x_ref, w_in_ref, w2_ref, vec_ref, o_ref, *,
                          batch, seq, num_heads, head_dim, mlp_dim, eps,
                          mm_dtype):
    layer = pl.program_id(0)
    d = num_heads * head_dim

    # Layer 0: seed the resident activation (output VMEM buffer) from x.
    @pl.when(layer == 0)
    def _():
        o_ref[...] = x_ref[...]

    x = o_ref[...]                              # [B*S, D] activation, carried in VMEM

    w_in = w_in_ref[0]                          # [D, 3D + D + MLP]
    w2 = w2_ref[0]                              # [MLP, D]
    vec = vec_ref[0]                            # [8, W]

    ln1_g = vec[0:1, :d]
    ln1_b = vec[1:2, :d]
    bo    = vec[2:3, :d]
    ln2_g = vec[3:4, :d]
    ln2_b = vec[4:5, :d]
    b2    = vec[5:6, :d]
    b1    = vec[6:7, :mlp_dim]
    bqkv  = vec[7:8, :3 * d]

    # ---------------- LayerNorm 1 (single-pass variance) ----------------
    mu = jnp.mean(x, axis=-1, keepdims=True)
    var = jnp.mean(x * x, axis=-1, keepdims=True) - mu * mu
    h = (x - mu) * lax.rsqrt(var + eps) * ln1_g + ln1_b

    # ---------------- fused QKV projection (Q scale folded into weights) ----
    qkv = _dot(h, w_in[:, :3 * d], mm_dtype) + bqkv      # [B*S, 3D]

    wo = w_in[:, 3 * d:4 * d]                             # [D, D]
    w1 = w_in[:, 4 * d:]                                  # [D, MLP]

    # ---------------- multi-head attention (out-proj folded into head loop) -
    outs = []
    for b in range(batch):                                 # static unroll over batch
        r = b * seq
        proj = None
        for hh in range(num_heads):                        # static unroll over heads
            lo, hi = hh * head_dim, (hh + 1) * head_dim
            qh = qkv[r:r + seq, lo:hi]
            kh = qkv[r:r + seq, d + lo:d + hi]
            vh = qkv[r:r + seq, 2 * d + lo:2 * d + hi]
            s = _dot(qh, kh.T, mm_dtype)                   # scale already in wq/bq
            s = s - jnp.max(s, axis=-1, keepdims=True)
            p = jnp.exp(s)
            p = p * pl.reciprocal(jnp.sum(p, axis=-1, keepdims=True), approx=True)
            ho = _dot(p, vh, mm_dtype)                     # [S, hd]
            contrib = _dot(ho, wo[lo:hi, :], mm_dtype)     # [S, D], sublane-aligned slice
            proj = contrib if proj is None else proj + contrib
        outs.append(proj)
    attn = jnp.concatenate(outs, axis=0) + bo              # sublane-axis concat (cheap)
    x1 = x + attn

    # ---------------- LayerNorm 2 ----------------
    mu2 = jnp.mean(x1, axis=-1, keepdims=True)
    var2 = jnp.mean(x1 * x1, axis=-1, keepdims=True) - mu2 * mu2
    h2 = (x1 - mu2) * lax.rsqrt(var2 + eps) * ln2_g + ln2_b

    # ---------------- MLP: linear1 -> gelu(tanh) -> linear2 ----------------
    y = _dot(h2, w1, mm_dtype) + b1
    c = math.sqrt(2.0 / math.pi)
    y = 0.5 * y * (1.0 + jnp.tanh(c * (y + 0.044715 * y * y * y)))
    y = _dot(y, w2, mm_dtype) + b2

    # final residual -> carried activation / output
    o_ref[...] = (x1 + y).astype(o_ref.dtype)


# ------------------------------ wrapper --------------------------------------
def mae_encoder_layers(x, packed, *, num_heads=NUM_HEADS, eps=LN_EPS,
                       mm_dtype=jnp.float32):
    """Apply L fused MAE encoder layers in ONE pallas_call. x: [B, S, D]."""
    w_in, w2, vec = packed
    b, s, d = x.shape
    bs = b * s
    n_layers = w_in.shape[0]
    mlp_dim = w2.shape[1]
    head_dim = d // num_heads

    kernel = functools.partial(
        _encoder_layer_kernel, batch=b, seq=s, num_heads=num_heads,
        head_dim=head_dim, mlp_dim=mlp_dim, eps=eps, mm_dtype=mm_dtype)

    x2d = x.reshape(bs, d)
    out = pl.pallas_call(
        kernel,
        out_shape=jax.ShapeDtypeStruct((bs, d), jnp.float32),
        grid=(n_layers,),
        in_specs=[
            pl.BlockSpec((bs, d), lambda l: (0, 0)),                   # activation (resident)
            pl.BlockSpec((1, d, w_in.shape[2]), lambda l: (l, 0, 0)),  # per-layer weight slab
            pl.BlockSpec((1, mlp_dim, d), lambda l: (l, 0, 0)),        # per-layer mlp linear2
            pl.BlockSpec((1, 8, vec.shape[2]), lambda l: (l, 0, 0)),   # per-layer vectors/biases
        ],
        out_specs=pl.BlockSpec((bs, d), lambda l: (0, 0)),             # carried activation
        compiler_params=pltpu.CompilerParams(
            dimension_semantics=("arbitrary",)),
    )(x2d, w_in, w2, vec)
    return out.reshape(b, s, d)


# --------------------------- parameter packing -------------------------------
def pack_encoder_params(layer_params, *, num_heads=NUM_HEADS):
    """Pack per-layer parameter dicts into 3 stacked slabs (done once, offline).

    Also folds the attention scale head_dim**-0.5 into the Q projection
    (weight AND bias)."""
    d = layer_params[0]["wo"].shape[0]
    mlp = layer_params[0]["w1"].shape[1]
    hd = d // num_heads
    scale = hd ** (-0.5)
    vec_w = max(128, 3 * d, mlp)

    def padrow(v):
        return jnp.pad(v, (0, vec_w - v.shape[0]))[None, :]

    w_in_l, w2_l, vec_l = [], [], []
    for p in layer_params:
        wqkv = p["wqkv"].at[:, :d].multiply(scale)
        bqkv = p["bqkv"].at[:d].multiply(scale)
        w_in = jnp.concatenate([wqkv, p["wo"], p["w1"]], axis=1)   # [D, 3D+D+MLP]
        vec = jnp.concatenate([
            padrow(p["ln1_g"]), padrow(p["ln1_b"]), padrow(p["bo"]),
            padrow(p["ln2_g"]), padrow(p["ln2_b"]), padrow(p["b2"]),
            padrow(p["b1"]), padrow(bqkv)], axis=0)                # [8, vec_w]
        w_in_l.append(w_in)
        w2_l.append(p["w2"])
        vec_l.append(vec)
    return (jnp.stack(w_in_l), jnp.stack(w2_l), jnp.stack(vec_l))


# --------------------------- pure-JAX reference ------------------------------
def reference_encoder_layer(x, p, *, num_heads=NUM_HEADS, eps=LN_EPS):
    b, s, d = x.shape
    hd = d // num_heads

    def ln(v, g, beta):
        mu = v.mean(-1, keepdims=True)
        var = ((v - mu) ** 2).mean(-1, keepdims=True)
        return (v - mu) / jnp.sqrt(var + eps) * g + beta

    h = ln(x, p["ln1_g"], p["ln1_b"])
    qkv = h @ p["wqkv"] + p["bqkv"]
    q, k, v = jnp.split(qkv, 3, axis=-1)

    def split_heads(t):
        return t.reshape(b, s, num_heads, hd).transpose(0, 2, 1, 3)

    q, k, v = split_heads(q), split_heads(k), split_heads(v)
    scores = jnp.einsum("bhqd,bhkd->bhqk", q, k) * hd ** (-0.5)
    w = jax.nn.softmax(scores, axis=-1)
    attn = jnp.einsum("bhqk,bhkd->bhqd", w, v).transpose(0, 2, 1, 3).reshape(b, s, d)
    attn = attn @ p["wo"] + p["bo"]
    x1 = x + attn

    h2 = ln(x1, p["ln2_g"], p["ln2_b"])
    y = h2 @ p["w1"] + p["b1"]
    c = math.sqrt(2.0 / math.pi)
    y = 0.5 * y * (1.0 + jnp.tanh(c * (y + 0.044715 * y ** 3)))
    y = y @ p["w2"] + p["b2"]
    return x1 + y


# ------------------------------ parameter init ------------------------------
def _init_linear(key, fan_in, fan_out):
    k1, k2 = jax.random.split(key)
    bound = 1.0 / math.sqrt(fan_in)
    w = jax.random.uniform(k1, (fan_in, fan_out), jnp.float32, -bound, bound)
    b = jax.random.uniform(k2, (fan_out,), jnp.float32, -bound, bound)
    return w, b


def init_encoder_layer_params(key, dim=D, mlp_dim=MLP_DIM):
    ks = jax.random.split(key, 6)
    wq, bq = _init_linear(ks[0], dim, dim)
    wk, bk = _init_linear(ks[1], dim, dim)
    wv, bv = _init_linear(ks[2], dim, dim)
    wo, bo = _init_linear(ks[3], dim, dim)
    w1, b1 = _init_linear(ks[4], dim, mlp_dim)
    w2, b2 = _init_linear(ks[5], mlp_dim, dim)
    return {
        "ln1_g": jnp.ones((dim,), jnp.float32), "ln1_b": jnp.zeros((dim,), jnp.float32),
        "ln2_g": jnp.ones((dim,), jnp.float32), "ln2_b": jnp.zeros((dim,), jnp.float32),
        "wqkv": jnp.concatenate([wq, wk, wv], axis=1),      # [D, 3D]
        "bqkv": jnp.concatenate([bq, bk, bv], axis=0),      # [3D]
        "wo": wo, "bo": bo,
        "w1": w1, "b1": b1, "w2": w2, "b2": b2,
    }


# ------------------------------------ main -----------------------------------
if __name__ == "__main__":
    root = jax.random.PRNGKey(0)
    k_x, k_p = jax.random.split(root)

    x = jax.random.normal(k_x, (B, S, D), jnp.float32)
    params = init_encoder_layer_params(k_p)

    # --- single MAE_EncoderLayer (L = 1) -> one grid step, one pallas_call ---
    packed1 = pack_encoder_params([params])
    fwd = jax.jit(mae_encoder_layers)
    out = fwd(x, packed1)
    jax.block_until_ready(out)
    assert out.shape == (B, S, D)

    ref = reference_encoder_layer(x, params)
    np.testing.assert_allclose(np.asarray(out), np.asarray(ref), atol=1e-2, rtol=1e-2)

    # --- bonus: 2 layers fused into ONE pallas_call (weights streamed over L) ---
    params_b = init_encoder_layer_params(jax.random.fold_in(k_p, 1))
    packed2 = pack_encoder_params([params, params_b])
    out2 = jax.jit(mae_encoder_layers)(x, packed2)
    jax.block_until_ready(out2)
    ref2 = reference_encoder_layer(reference_encoder_layer(x, params), params_b)
    np.testing.assert_allclose(np.asarray(out2), np.asarray(ref2), atol=1e-2, rtol=1e-2)

    print("KERNEL_OK")
</pallas_src>

<mosaic_0001>
module attributes {stable_mosaic.version = 11 : i64} {
  func.func @_encoder_layer_kernel(%arg0: i32, %arg1: memref<16x32xf32, #tpu.memory_space<vmem>>, %arg2: memref<1x32x256xf32, #tpu.memory_space<vmem>>, %arg3: memref<1x128x32xf32, #tpu.memory_space<vmem>>, %arg4: memref<1x8x128xf32, #tpu.memory_space<vmem>>, %arg5: memref<16x32xf32, #tpu.memory_space<vmem>>) attributes {dimension_semantics = [#tpu.dimension_semantics<arbitrary>], iteration_bounds = array<i64: 1>, scalar_prefetch = 0 : i64, scratch_operands = 0 : i64, tpu.core_type = #tpu.core_type<tc>, window_params = [{pipeline_mode = #tpu.pipeline_mode<synchronous>, transform_indices = @transform_0, window_bounds = array<i64: 16, 32>}, {transform_indices = @transform_1, window_bounds = array<i64: 1, 32, 256>}, {transform_indices = @transform_2, window_bounds = array<i64: 1, 128, 32>}, {transform_indices = @transform_3, window_bounds = array<i64: 1, 8, 128>}, {pipeline_mode = #tpu.pipeline_mode<synchronous>, transform_indices = @transform_4, window_bounds = array<i64: 16, 32>}]} {
    %c0_i32 = arith.constant 0 : i32
    %0 = arith.cmpi eq, %arg0, %c0_i32 : i32
    %1 = arith.extui %0 : i1 to i32
    %c0_i32_0 = arith.constant 0 : i32
    %2 = arith.cmpi ne, %1, %c0_i32_0 : i32
    scf.if %2 {
      %c0_69 = arith.constant 0 : index
      %c0_70 = arith.constant 0 : index
      %243 = vector.load %arg1[%c0_69, %c0_70] : memref<16x32xf32, #tpu.memory_space<vmem>>, vector<16x32xf32>
      %c0_71 = arith.constant 0 : index
      %c0_72 = arith.constant 0 : index
      %244 = vector.load %arg5[%c0_71, %c0_72] : memref<16x32xf32, #tpu.memory_space<vmem>>, vector<16x32xf32>
      tpu.vector_store %arg5[%c0_71, %c0_72], %243 {strides = array<i32>} : memref<16x32xf32, #tpu.memory_space<vmem>>, vector<16x32xf32>,
    } else {
    }
    %c0 = arith.constant 0 : index
    %c0_1 = arith.constant 0 : index
    %3 = vector.load %arg5[%c0, %c0_1] : memref<16x32xf32, #tpu.memory_space<vmem>>, vector<16x32xf32>
    %c0_2 = arith.constant 0 : index
    %c0_3 = arith.constant 0 : index
    %c0_4 = arith.constant 0 : index
    %4 = vector.load %arg2[%c0_2, %c0_3, %c0_4] : memref<1x32x256xf32, #tpu.memory_space<vmem>>, vector<1x32x256xf32>
    %5 = vector.shape_cast %4 : vector<1x32x256xf32> to vector<32x256xf32>
    %c0_5 = arith.constant 0 : index
    %c0_6 = arith.constant 0 : index
    %c0_7 = arith.constant 0 : index
    %6 = vector.load %arg3[%c0_5, %c0_6, %c0_7] : memref<1x128x32xf32, #tpu.memory_space<vmem>>, vector<1x128x32xf32>
    %7 = vector.shape_cast %6 : vector<1x128x32xf32> to vector<128x32xf32>
    %c0_8 = arith.constant 0 : index
    %c0_9 = arith.constant 0 : index
    %c0_10 = arith.constant 0 : index
    %8 = vector.load %arg4[%c0_8, %c0_9, %c0_10] : memref<1x8x128xf32, #tpu.memory_space<vmem>>, vector<1x8x128xf32>
    %9 = vector.shape_cast %8 : vector<1x8x128xf32> to vector<8x128xf32>
    %10 = vector.extract_strided_slice %9 {offsets = [0, 0], sizes = [1, 32], strides = [1, 1]} : vector<8x128xf32> to vector<1x32xf32>
    %11 = vector.extract_strided_slice %9 {offsets = [1, 0], sizes = [1, 32], strides = [1, 1]} : vector<8x128xf32> to vector<1x32xf32>
    %12 = vector.extract_strided_slice %9 {offsets = [2, 0], sizes = [1, 32], strides = [1, 1]} : vector<8x128xf32> to vector<1x32xf32>
    %13 = vector.extract_strided_slice %9 {offsets = [3, 0], sizes = [1, 32], strides = [1, 1]} : vector<8x128xf32> to vector<1x32xf32>
    %14 = vector.extract_strided_slice %9 {offsets = [4, 0], sizes = [1, 32], strides = [1, 1]} : vector<8x128xf32> to vector<1x32xf32>
    %15 = vector.extract_strided_slice %9 {offsets = [5, 0], sizes = [1, 32], strides = [1, 1]} : vector<8x128xf32> to vector<1x32xf32>
    %16 = vector.extract_strided_slice %9 {offsets = [6, 0], sizes = [1, 128], strides = [1, 1]} : vector<8x128xf32> to vector<1x128xf32>
    %17 = vector.extract_strided_slice %9 {offsets = [7, 0], sizes = [1, 96], strides = [1, 1]} : vector<8x128xf32> to vector<1x96xf32>
    %cst = arith.constant dense<0.000000e+00> : vector<16xf32>
    %18 = vector.multi_reduction <add>, %3, %cst [1] : vector<16x32xf32> to vector<16xf32>
    %19 = vector.shape_cast %18 : vector<16xf32> to vector<16x1xf32>
    %cst_11 = arith.constant 3.200000e+01 : f32
    %20 = vector.broadcast %cst_11 : f32 to vector<16x1xf32>
    %21 = arith.divf %19, %20 : vector<16x1xf32>
    %22 = arith.mulf %3, %3 : vector<16x32xf32>
    %cst_12 = arith.constant dense<0.000000e+00> : vector<16xf32>
    %23 = vector.multi_reduction <add>, %22, %cst_12 [1] : vector<16x32xf32> to vector<16xf32>
    %24 = vector.shape_cast %23 : vector<16xf32> to vector<16x1xf32>
    %cst_13 = arith.constant 3.200000e+01 : f32
    %25 = vector.broadcast %cst_13 : f32 to vector<16x1xf32>
    %26 = arith.divf %24, %25 : vector<16x1xf32>
    %27 = arith.mulf %21, %21 : vector<16x1xf32>
    %28 = arith.subf %26, %27 : vector<16x1xf32>
    %29 = vector.broadcast %21 : vector<16x1xf32> to vector<16x32xf32>
    %30 = arith.subf %3, %29 : vector<16x32xf32>
    %cst_14 = arith.constant 9.99999974E-6 : f32
    %31 = vector.broadcast %cst_14 : f32 to vector<16x1xf32>
    %32 = arith.addf %28, %31 : vector<16x1xf32>
    %33 = math.rsqrt %32 : vector<16x1xf32>
    %34 = vector.broadcast %33 : vector<16x1xf32> to vector<16x32xf32>
    %35 = arith.mulf %30, %34 : vector<16x32xf32>
    %36 = vector.broadcast %10 : vector<1x32xf32> to vector<16x32xf32>
    %37 = arith.mulf %35, %36 : vector<16x32xf32>
    %38 = vector.broadcast %11 : vector<1x32xf32> to vector<16x32xf32>
    %39 = arith.addf %37, %38 : vector<16x32xf32>
    %40 = vector.extract_strided_slice %5 {offsets = [0, 0], sizes = [32, 96], strides = [1, 1]} : vector<32x256xf32> to vector<32x96xf32>
    %cst_15 = arith.constant dense<0.000000e+00> : vector<16x96xf32>
    %41 = tpu.matmul %39, %40, %cst_15 {dimension_numbers = #tpu.dot_dimension_numbers<[1], [0], [0], [1], [0, 0, 1, 1], [], []>} : vector<16x32xf32>, vector<32x96xf32>, vector<16x96xf32> -> vector<16x96xf32>
    %42 = vector.broadcast %17 : vector<1x96xf32> to vector<16x96xf32>
    %43 = arith.addf %41, %42 : vector<16x96xf32>
    %44 = vector.extract_strided_slice %5 {offsets = [0, 96], sizes = [32, 32], strides = [1, 1]} : vector<32x256xf32> to vector<32x32xf32>
    %45 = vector.extract_strided_slice %5 {offsets = [0, 128], sizes = [32, 128], strides = [1, 1]} : vector<32x256xf32> to vector<32x128xf32>
    %46 = vector.extract_strided_slice %43 {offsets = [0, 0], sizes = [8, 8], strides = [1, 1]} : vector<16x96xf32> to vector<8x8xf32>
    %47 = vector.extract_strided_slice %43 {offsets = [0, 32], sizes = [8, 8], strides = [1, 1]} : vector<16x96xf32> to vector<8x8xf32>
    %48 = vector.extract_strided_slice %43 {offsets = [0, 64], sizes = [8, 8], strides = [1, 1]} : vector<16x96xf32> to vector<8x8xf32>
    %49 = tpu.transpose %47, [1, 0] : vector<8x8xf32> -> vector<8x8xf32>
    %cst_16 = arith.constant dense<0.000000e+00> : vector<8x8xf32>
    %50 = tpu.matmul %46, %49, %cst_16 {dimension_numbers = #tpu.dot_dimension_numbers<[1], [0], [0], [1], [0, 0, 1, 1], [], []>} : vector<8x8xf32>, vector<8x8xf32>, vector<8x8xf32> -> vector<8x8xf32>
    %cst_17 = arith.constant dense<0xFF800000> : vector<8xf32>
    %51 = vector.multi_reduction <maximumf>, %50, %cst_17 [1] : vector<8x8xf32> to vector<8xf32>
    %52 = vector.shape_cast %51 : vector<8xf32> to vector<8x1xf32>
    %53 = vector.broadcast %52 : vector<8x1xf32> to vector<8x8xf32>
    %54 = arith.subf %50, %53 : vector<8x8xf32>
    %55 = math.exp %54 : vector<8x8xf32>
    %cst_18 = arith.constant dense<0.000000e+00> : vector<8xf32>
    %56 = vector.multi_reduction <add>, %55, %cst_18 [1] : vector<8x8xf32> to vector<8xf32>
    %57 = vector.shape_cast %56 : vector<8xf32> to vector<8x1xf32>
    %58 = tpu.reciprocal %57 {approx = true} : vector<8x1xf32> -> vector<8x1xf32>
    %59 = vector.broadcast %58 : vector<8x1xf32> to vector<8x8xf32>
    %60 = arith.mulf %55, %59 : vector<8x8xf32>
    %cst_19 = arith.constant dense<0.000000e+00> : vector<8x8xf32>
    %61 = tpu.matmul %60, %48, %cst_19 {dimension_numbers = #tpu.dot_dimension_numbers<[1], [0], [0], [1], [0, 0, 1, 1], [], []>} : vector<8x8xf32>, vector<8x8xf32>, vector<8x8xf32> -> vector<8x8xf32>
    %62 = vector.extract_strided_slice %44 {offsets = [0, 0], sizes = [8, 32], strides = [1, 1]} : vector<32x32xf32> to vector<8x32xf32>
    %cst_20 = arith.constant dense<0.000000e+00> : vector<8x32xf32>
    %63 = tpu.matmul %61, %62, %cst_20 {dimension_numbers = #tpu.dot_dimension_numbers<[1], [0], [0], [1], [0, 0, 1, 1], [], []>} : vector<8x8xf32>, vector<8x32xf32>, vector<8x32xf32> -> vector<8x32xf32>
    %64 = vector.extract_strided_slice %43 {offsets = [0, 8], sizes = [8, 8], strides = [1, 1]} : vector<16x96xf32> to vector<8x8xf32>
    %65 = vector.extract_strided_slice %43 {offsets = [0, 40], sizes = [8, 8], strides = [1, 1]} : vector<16x96xf32> to vector<8x8xf32>
    %66 = vector.extract_strided_slice %43 {offsets = [0, 72], sizes = [8, 8], strides = [1, 1]} : vector<16x96xf32> to vector<8x8xf32>
    %67 = tpu.transpose %65, [1, 0] : vector<8x8xf32> -> vector<8x8xf32>
    %cst_21 = arith.constant dense<0.000000e+00> : vector<8x8xf32>
    %68 = tpu.matmul %64, %67, %cst_21 {dimension_numbers = #tpu.dot_dimension_numbers<[1], [0], [0], [1], [0, 0, 1, 1], [], []>} : vector<8x8xf32>, vector<8x8xf32>, vector<8x8xf32> -> vector<8x8xf32>
    %cst_22 = arith.constant dense<0xFF800000> : vector<8xf32>
    %69 = vector.multi_reduction <maximumf>, %68, %cst_22 [1] : vector<8x8xf32> to vector<8xf32>
    %70 = vector.shape_cast %69 : vector<8xf32> to vector<8x1xf32>
    %71 = vector.broadcast %70 : vector<8x1xf32> to vector<8x8xf32>
    %72 = arith.subf %68, %71 : vector<8x8xf32>
    %73 = math.exp %72 : vector<8x8xf32>
    %cst_23 = arith.constant dense<0.000000e+00> : vector<8xf32>
    %74 = vector.multi_reduction <add>, %73, %cst_23 [1] : vector<8x8xf32> to vector<8xf32>
    %75 = vector.shape_cast %74 : vector<8xf32> to vector<8x1xf32>
    %76 = tpu.reciprocal %75 {approx = true} : vector<8x1xf32> -> vector<8x1xf32>
    %77 = vector.broadcast %76 : vector<8x1xf32> to vector<8x8xf32>
    %78 = arith.mulf %73, %77 : vector<8x8xf32>
    %cst_24 = arith.constant dense<0.000000e+00> : vector<8x8xf32>
    %79 = tpu.matmul %78, %66, %cst_24 {dimension_numbers = #tpu.dot_dimension_numbers<[1], [0], [0], [1], [0, 0, 1, 1], [], []>} : vector<8x8xf32>, vector<8x8xf32>, vector<8x8xf32> -> vector<8x8xf32>
    %80 = vector.extract_strided_slice %44 {offsets = [8, 0], sizes = [8, 32], strides = [1, 1]} : vector<32x32xf32> to vector<8x32xf32>
    %cst_25 = arith.constant dense<0.000000e+00> : vector<8x32xf32>
    %81 = tpu.matmul %79, %80, %cst_25 {dimension_numbers = #tpu.dot_dimension_numbers<[1], [0], [0], [1], [0, 0, 1, 1], [], []>} : vector<8x8xf32>, vector<8x32xf32>, vector<8x32xf32> -> vector<8x32xf32>
    %82 = arith.addf %63, %81 : vector<8x32xf32>
    %83 = vector.extract_strided_slice %43 {offsets = [0, 16], sizes = [8, 8], strides = [1, 1]} : vector<16x96xf32> to vector<8x8xf32>
    %84 = vector.extract_strided_slice %43 {offsets = [0, 48], sizes = [8, 8], strides = [1, 1]} : vector<16x96xf32> to vector<8x8xf32>
    %85 = vector.extract_strided_slice %43 {offsets = [0, 80], sizes = [8, 8], strides = [1, 1]} : vector<16x96xf32> to vector<8x8xf32>
    %86 = tpu.transpose %84, [1, 0] : vector<8x8xf32> -> vector<8x8xf32>
    %cst_26 = arith.constant dense<0.000000e+00> : vector<8x8xf32>
    %87 = tpu.matmul %83, %86, %cst_26 {dimension_numbers = #tpu.dot_dimension_numbers<[1], [0], [0], [1], [0, 0, 1, 1], [], []>} : vector<8x8xf32>, vector<8x8xf32>, vector<8x8xf32> -> vector<8x8xf32>
    %cst_27 = arith.constant dense<0xFF800000> : vector<8xf32>
    %88 = vector.multi_reduction <maximumf>, %87, %cst_27 [1] : vector<8x8xf32> to vector<8xf32>
    %89 = vector.shape_cast %88 : vector<8xf32> to vector<8x1xf32>
    %90 = vector.broadcast %89 : vector<8x1xf32> to vector<8x8xf32>
    %91 = arith.subf %87, %90 : vector<8x8xf32>
    %92 = math.exp %91 : vector<8x8xf32>
    %cst_28 = arith.constant dense<0.000000e+00> : vector<8xf32>
    %93 = vector.multi_reduction <add>, %92, %cst_28 [1] : vector<8x8xf32> to vector<8xf32>
    %94 = vector.shape_cast %93 : vector<8xf32> to vector<8x1xf32>
    %95 = tpu.reciprocal %94 {approx = true} : vector<8x1xf32> -> vector<8x1xf32>
    %96 = vector.broadcast %95 : vector<8x1xf32> to vector<8x8xf32>
    %97 = arith.mulf %92, %96 : vector<8x8xf32>
    %cst_29 = arith.constant dense<0.000000e+00> : vector<8x8xf32>
    %98 = tpu.matmul %97, %85, %cst_29 {dimension_numbers = #tpu.dot_dimension_numbers<[1], [0], [0], [1], [0, 0, 1, 1], [], []>} : vector<8x8xf32>, vector<8x8xf32>, vector<8x8xf32> -> vector<8x8xf32>
    %99 = vector.extract_strided_slice %44 {offsets = [16, 0], sizes = [8, 32], strides = [1, 1]} : vector<32x32xf32> to vector<8x32xf32>
    %cst_30 = arith.constant dense<0.000000e+00> : vector<8x32xf32>
    %100 = tpu.matmul %98, %99, %cst_30 {dimension_numbers = #tpu.dot_dimension_numbers<[1], [0], [0], [1], [0, 0, 1, 1], [], []>} : vector<8x8xf32>, vector<8x32xf32>, vector<8x32xf32> -> vector<8x32xf32>
    %101 = arith.addf %82, %100 : vector<8x32xf32>
    %102 = vector.extract_strided_slice %43 {offsets = [0, 24], sizes = [8, 8], strides = [1, 1]} : vector<16x96xf32> to vector<8x8xf32>
    %103 = vector.extract_strided_slice %43 {offsets = [0, 56], sizes = [8, 8], strides = [1, 1]} : vector<16x96xf32> to vector<8x8xf32>
    %104 = vector.extract_strided_slice %43 {offsets = [0, 88], sizes = [8, 8], strides = [1, 1]} : vector<16x96xf32> to vector<8x8xf32>
    %105 = tpu.transpose %103, [1, 0] : vector<8x8xf32> -> vector<8x8xf32>
    %cst_31 = arith.constant dense<0.000000e+00> : vector<8x8xf32>
    %106 = tpu.matmul %102, %105, %cst_31 {dimension_numbers = #tpu.dot_dimension_numbers<[1], [0], [0], [1], [0, 0, 1, 1], [], []>} : vector<8x8xf32>, vector<8x8xf32>, vector<8x8xf32> -> vector<8x8xf32>
    %cst_32 = arith.constant dense<0xFF800000> : vector<8xf32>
    %107 = vector.multi_reduction <maximumf>, %106, %cst_32 [1] : vector<8x8xf32> to vector<8xf32>
    %108 = vector.shape_cast %107 : vector<8xf32> to vector<8x1xf32>
    %109 = vector.broadcast %108 : vector<8x1xf32> to vector<8x8xf32>
    %110 = arith.subf %106, %109 : vector<8x8xf32>
    %111 = math.exp %110 : vector<8x8xf32>
    %cst_33 = arith.constant dense<0.000000e+00> : vector<8xf32>
    %112 = vector.multi_reduction <add>, %111, %cst_33 [1] : vector<8x8xf32> to vector<8xf32>
    %113 = vector.shape_cast %112 : vector<8xf32> to vector<8x1xf32>
    %114 = tpu.reciprocal %113 {approx = true} : vector<8x1xf32> -> vector<8x1xf32>
    %115 = vector.broadcast %114 : vector<8x1xf32> to vector<8x8xf32>
    %116 = arith.mulf %111, %115 : vector<8x8xf32>
    %cst_34 = arith.constant dense<0.000000e+00> : vector<8x8xf32>
    %117 = tpu.matmul %116, %104, %cst_34 {dimension_numbers = #tpu.dot_dimension_numbers<[1], [0], [0], [1], [0, 0, 1, 1], [], []>} : vector<8x8xf32>, vector<8x8xf32>, vector<8x8xf32> -> vector<8x8xf32>
    %118 = vector.extract_strided_slice %44 {offsets = [24, 0], sizes = [8, 32], strides = [1, 1]} : vector<32x32xf32> to vector<8x32xf32>
    %cst_35 = arith.constant dense<0.000000e+00> : vector<8x32xf32>
    %119 = tpu.matmul %117, %118, %cst_35 {dimension_numbers = #tpu.dot_dimension_numbers<[1], [0], [0], [1], [0, 0, 1, 1], [], []>} : vector<8x8xf32>, vector<8x32xf32>, vector<8x32xf32> -> vector<8x32xf32>
    %120 = arith.addf %101, %119 : vector<8x32xf32>
    %121 = vector.extract_strided_slice %43 {offsets = [8, 0], sizes = [8, 8], strides = [1, 1]} : vector<16x96xf32> to vector<8x8xf32>
    %122 = vector.extract_strided_slice %43 {offsets = [8, 32], sizes = [8, 8], strides = [1, 1]} : vector<16x96xf32> to vector<8x8xf32>
    %123 = vector.extract_strided_slice %43 {offsets = [8, 64], sizes = [8, 8], strides = [1, 1]} : vector<16x96xf32> to vector<8x8xf32>
    %124 = tpu.transpose %122, [1, 0] : vector<8x8xf32> -> vector<8x8xf32>
    %cst_36 = arith.constant dense<0.000000e+00> : vector<8x8xf32>
    %125 = tpu.matmul %121, %124, %cst_36 {dimension_numbers = #tpu.dot_dimension_numbers<[1], [0], [0], [1], [0, 0, 1, 1], [], []>} : vector<8x8xf32>, vector<8x8xf32>, vector<8x8xf32> -> vector<8x8xf32>
    %cst_37 = arith.constant dense<0xFF800000> : vector<8xf32>
    %126 = vector.multi_reduction <maximumf>, %125, %cst_37 [1] : vector<8x8xf32> to vector<8xf32>
    %127 = vector.shape_cast %126 : vector<8xf32> to vector<8x1xf32>
    %128 = vector.broadcast %127 : vector<8x1xf32> to vector<8x8xf32>
    %129 = arith.subf %125, %128 : vector<8x8xf32>
    %130 = math.exp %129 : vector<8x8xf32>
    %cst_38 = arith.constant dense<0.000000e+00> : vector<8xf32>
    %131 = vector.multi_reduction <add>, %130, %cst_38 [1] : vector<8x8xf32> to vector<8xf32>
    %132 = vector.shape_cast %131 : vector<8xf32> to vector<8x1xf32>
    %133 = tpu.reciprocal %132 {approx = true} : vector<8x1xf32> -> vector<8x1xf32>
    %134 = vector.broadcast %133 : vector<8x1xf32> to vector<8x8xf32>
    %135 = arith.mulf %130, %134 : vector<8x8xf32>
    %cst_39 = arith.constant dense<0.000000e+00> : vector<8x8xf32>
    %136 = tpu.matmul %135, %123, %cst_39 {dimension_numbers = #tpu.dot_dimension_numbers<[1], [0], [0], [1], [0, 0, 1, 1], [], []>} : vector<8x8xf32>, vector<8x8xf32>, vector<8x8xf32> -> vector<8x8xf32>
    %137 = vector.extract_strided_slice %44 {offsets = [0, 0], sizes = [8, 32], strides = [1, 1]} : vector<32x32xf32> to vector<8x32xf32>
    %cst_40 = arith.constant dense<0.000000e+00> : vector<8x32xf32>
    %138 = tpu.matmul %136, %137, %cst_40 {dimension_numbers = #tpu.dot_dimension_numbers<[1], [0], [0], [1], [0, 0, 1, 1], [], []>} : vector<8x8xf32>, vector<8x32xf32>, vector<8x32xf32> -> vector<8x32xf32>
    %139 = vector.extract_strided_slice %43 {offsets = [8, 8], sizes = [8, 8], strides = [1, 1]} : vector<16x96xf32> to vector<8x8xf32>
    %140 = vector.extract_strided_slice %43 {offsets = [8, 40], sizes = [8, 8], strides = [1, 1]} : vector<16x96xf32> to vector<8x8xf32>
    %141 = vector.extract_strided_slice %43 {offsets = [8, 72], sizes = [8, 8], strides = [1, 1]} : vector<16x96xf32> to vector<8x8xf32>
    %142 = tpu.transpose %140, [1, 0] : vector<8x8xf32> -> vector<8x8xf32>
    %cst_41 = arith.constant dense<0.000000e+00> : vector<8x8xf32>
    %143 = tpu.matmul %139, %142, %cst_41 {dimension_numbers = #tpu.dot_dimension_numbers<[1], [0], [0], [1], [0, 0, 1, 1], [], []>} : vector<8x8xf32>, vector<8x8xf32>, vector<8x8xf32> -> vector<8x8xf32>
    %cst_42 = arith.constant dense<0xFF800000> : vector<8xf32>
    %144 = vector.multi_reduction <maximumf>, %143, %cst_42 [1] : vector<8x8xf32> to vector<8xf32>
    %145 = vector.shape_cast %144 : vector<8xf32> to vector<8x1xf32>
    %146 = vector.broadcast %145 : vector<8x1xf32> to vector<8x8xf32>
    %147 = arith.subf %143, %146 : vector<8x8xf32>
    %148 = math.exp %147 : vector<8x8xf32>
    %cst_43 = arith.constant dense<0.000000e+00> : vector<8xf32>
    %149 = vector.multi_reduction <add>, %148, %cst_43 [1] : vector<8x8xf32> to vector<8xf32>
    %150 = vector.shape_cast %149 : vector<8xf32> to vector<8x1xf32>
    %151 = tpu.reciprocal %150 {approx = true} : vector<8x1xf32> -> vector<8x1xf32>
    %152 = vector.broadcast %151 : vector<8x1xf32> to vector<8x8xf32>
    %153 = arith.mulf %148, %152 : vector<8x8xf32>
    %cst_44 = arith.constant dense<0.000000e+00> : vector<8x8xf32>
    %154 = tpu.matmul %153, %141, %cst_44 {dimension_numbers = #tpu.dot_dimension_numbers<[1], [0], [0], [1], [0, 0, 1, 1], [], []>} : vector<8x8xf32>, vector<8x8xf32>, vector<8x8xf32> -> vector<8x8xf32>
    %155 = vector.extract_strided_slice %44 {offsets = [8, 0], sizes = [8, 32], strides = [1, 1]} : vector<32x32xf32> to vector<8x32xf32>
    %cst_45 = arith.constant dense<0.000000e+00> : vector<8x32xf32>
    %156 = tpu.matmul %154, %155, %cst_45 {dimension_numbers = #tpu.dot_dimension_numbers<[1], [0], [0], [1], [0, 0, 1, 1], [], []>} : vector<8x8xf32>, vector<8x32xf32>, vector<8x32xf32> -> vector<8x32xf32>
    %157 = arith.addf %138, %156 : vector<8x32xf32>
    %158 = vector.extract_strided_slice %43 {offsets = [8, 16], sizes = [8, 8], strides = [1, 1]} : vector<16x96xf32> to vector<8x8xf32>
    %159 = vector.extract_strided_slice %43 {offsets = [8, 48], sizes = [8, 8], strides = [1, 1]} : vector<16x96xf32> to vector<8x8xf32>
    %160 = vector.extract_strided_slice %43 {offsets = [8, 80], sizes = [8, 8], strides = [1, 1]} : vector<16x96xf32> to vector<8x8xf32>
    %161 = tpu.transpose %159, [1, 0] : vector<8x8xf32> -> vector<8x8xf32>
    %cst_46 = arith.constant dense<0.000000e+00> : vector<8x8xf32>
    %162 = tpu.matmul %158, %161, %cst_46 {dimension_numbers = #tpu.dot_dimension_numbers<[1], [0], [0], [1], [0, 0, 1, 1], [], []>} : vector<8x8xf32>, vector<8x8xf32>, vector<8x8xf32> -> vector<8x8xf32>
    %cst_47 = arith.constant dense<0xFF800000> : vector<8xf32>
    %163 = vector.multi_reduction <maximumf>, %162, %cst_47 [1] : vector<8x8xf32> to vector<8xf32>
    %164 = vector.shape_cast %163 : vector<8xf32> to vector<8x1xf32>
    %165 = vector.broadcast %164 : vector<8x1xf32> to vector<8x8xf32>
    %166 = arith.subf %162, %165 : vector<8x8xf32>
    %167 = math.exp %166 : vector<8x8xf32>
    %cst_48 = arith.constant dense<0.000000e+00> : vector<8xf32>
    %168 = vector.multi_reduction <add>, %167, %cst_48 [1] : vector<8x8xf32> to vector<8xf32>
    %169 = vector.shape_cast %168 : vector<8xf32> to vector<8x1xf32>
    %170 = tpu.reciprocal %169 {approx = true} : vector<8x1xf32> -> vector<8x1xf32>
    %171 = vector.broadcast %170 : vector<8x1xf32> to vector<8x8xf32>
    %172 = arith.mulf %167, %171 : vector<8x8xf32>
    %cst_49 = arith.constant dense<0.000000e+00> : vector<8x8xf32>
    %173 = tpu.matmul %172, %160, %cst_49 {dimension_numbers = #tpu.dot_dimension_numbers<[1], [0], [0], [1], [0, 0, 1, 1], [], []>} : vector<8x8xf32>, vector<8x8xf32>, vector<8x8xf32> -> vector<8x8xf32>
    %174 = vector.extract_strided_slice %44 {offsets = [16, 0], sizes = [8, 32], strides = [1, 1]} : vector<32x32xf32> to vector<8x32xf32>
    %cst_50 = arith.constant dense<0.000000e+00> : vector<8x32xf32>
    %175 = tpu.matmul %173, %174, %cst_50 {dimension_numbers = #tpu.dot_dimension_numbers<[1], [0], [0], [1], [0, 0, 1, 1], [], []>} : vector<8x8xf32>, vector<8x32xf32>, vector<8x32xf32> -> vector<8x32xf32>
    %176 = arith.addf %157, %175 : vector<8x32xf32>
    %177 = vector.extract_strided_slice %43 {offsets = [8, 24], sizes = [8, 8], strides = [1, 1]} : vector<16x96xf32> to vector<8x8xf32>
    %178 = vector.extract_strided_slice %43 {offsets = [8, 56], sizes = [8, 8], strides = [1, 1]} : vector<16x96xf32> to vector<8x8xf32>
    %179 = vector.extract_strided_slice %43 {offsets = [8, 88], sizes = [8, 8], strides = [1, 1]} : vector<16x96xf32> to vector<8x8xf32>
    %180 = tpu.transpose %178, [1, 0] : vector<8x8xf32> -> vector<8x8xf32>
    %cst_51 = arith.constant dense<0.000000e+00> : vector<8x8xf32>
    %181 = tpu.matmul %177, %180, %cst_51 {dimension_numbers = #tpu.dot_dimension_numbers<[1], [0], [0], [1], [0, 0, 1, 1], [], []>} : vector<8x8xf32>, vector<8x8xf32>, vector<8x8xf32> -> vector<8x8xf32>
    %cst_52 = arith.constant dense<0xFF800000> : vector<8xf32>
    %182 = vector.multi_reduction <maximumf>, %181, %cst_52 [1] : vector<8x8xf32> to vector<8xf32>
    %183 = vector.shape_cast %182 : vector<8xf32> to vector<8x1xf32>
    %184 = vector.broadcast %183 : vector<8x1xf32> to vector<8x8xf32>
    %185 = arith.subf %181, %184 : vector<8x8xf32>
    %186 = math.exp %185 : vector<8x8xf32>
    %cst_53 = arith.constant dense<0.000000e+00> : vector<8xf32>
    %187 = vector.multi_reduction <add>, %186, %cst_53 [1] : vector<8x8xf32> to vector<8xf32>
    %188 = vector.shape_cast %187 : vector<8xf32> to vector<8x1xf32>
    %189 = tpu.reciprocal %188 {approx = true} : vector<8x1xf32> -> vector<8x1xf32>
    %190 = vector.broadcast %189 : vector<8x1xf32> to vector<8x8xf32>
    %191 = arith.mulf %186, %190 : vector<8x8xf32>
    %cst_54 = arith.constant dense<0.000000e+00> : vector<8x8xf32>
    %192 = tpu.matmul %191, %179, %cst_54 {dimension_numbers = #tpu.dot_dimension_numbers<[1], [0], [0], [1], [0, 0, 1, 1], [], []>} : vector<8x8xf32>, vector<8x8xf32>, vector<8x8xf32> -> vector<8x8xf32>
    %193 = vector.extract_strided_slice %44 {offsets = [24, 0], sizes = [8, 32], strides = [1, 1]} : vector<32x32xf32> to vector<8x32xf32>
    %cst_55 = arith.constant dense<0.000000e+00> : vector<8x32xf32>
    %194 = tpu.matmul %192, %193, %cst_55 {dimension_numbers = #tpu.dot_dimension_numbers<[1], [0], [0], [1], [0, 0, 1, 1], [], []>} : vector<8x8xf32>, vector<8x32xf32>, vector<8x32xf32> -> vector<8x32xf32>
    %195 = arith.addf %176, %194 : vector<8x32xf32>
    %196 = tpu.concatenate %120, %195 in 0 : vector<8x32xf32>, vector<8x32xf32> -> vector<16x32xf32>
    %197 = vector.broadcast %12 : vector<1x32xf32> to vector<16x32xf32>
    %198 = arith.addf %196, %197 : vector<16x32xf32>
    %199 = arith.addf %3, %198 : vector<16x32xf32>
    %cst_56 = arith.constant dense<0.000000e+00> : vector<16xf32>
    %200 = vector.multi_reduction <add>, %199, %cst_56 [1] : vector<16x32xf32> to vector<16xf32>
    %201 = vector.shape_cast %200 : vector<16xf32> to vector<16x1xf32>
    %cst_57 = arith.constant 3.200000e+01 : f32
    %202 = vector.broadcast %cst_57 : f32 to vector<16x1xf32>
    %203 = arith.divf %201, %202 : vector<16x1xf32>
    %204 = arith.mulf %199, %199 : vector<16x32xf32>
    %cst_58 = arith.constant dense<0.000000e+00> : vector<16xf32>
    %205 = vector.multi_reduction <add>, %204, %cst_58 [1] : vector<16x32xf32> to vector<16xf32>
    %206 = vector.shape_cast %205 : vector<16xf32> to vector<16x1xf32>
    %cst_59 = arith.constant 3.200000e+01 : f32
    %207 = vector.broadcast %cst_59 : f32 to vector<16x1xf32>
    %208 = arith.divf %206, %207 : vector<16x1xf32>
    %209 = arith.mulf %203, %203 : vector<16x1xf32>
    %210 = arith.subf %208, %209 : vector<16x1xf32>
    %211 = vector.broadcast %203 : vector<16x1xf32> to vector<16x32xf32>
    %212 = arith.subf %199, %211 : vector<16x32xf32>
    %cst_60 = arith.constant 9.99999974E-6 : f32
    %213 = vector.broadcast %cst_60 : f32 to vector<16x1xf32>
    %214 = arith.addf %210, %213 : vector<16x1xf32>
    %215 = math.rsqrt %214 : vector<16x1xf32>
    %216 = vector.broadcast %215 : vector<16x1xf32> to vector<16x32xf32>
    %217 = arith.mulf %212, %216 : vector<16x32xf32>
    %218 = vector.broadcast %13 : vector<1x32xf32> to vector<16x32xf32>
    %219 = arith.mulf %217, %218 : vector<16x32xf32>
    %220 = vector.broadcast %14 : vector<1x32xf32> to vector<16x32xf32>
    %221 = arith.addf %219, %220 : vector<16x32xf32>
    %cst_61 = arith.constant dense<0.000000e+00> : vector<16x128xf32>
    %222 = tpu.matmul %221, %45, %cst_61 {dimension_numbers = #tpu.dot_dimension_numbers<[1], [0], [0], [1], [0, 0, 1, 1], [], []>} : vector<16x32xf32>, vector<32x128xf32>, vector<16x128xf32> -> vector<16x128xf32>
    %223 = vector.broadcast %16 : vector<1x128xf32> to vector<16x128xf32>
    %224 = arith.addf %222, %223 : vector<16x128xf32>
    %cst_62 = arith.constant 5.000000e-01 : f32
    %225 = vector.broadcast %cst_62 : f32 to vector<16x128xf32>
    %226 = arith.mulf %225, %224 : vector<16x128xf32>
    %cst_63 = arith.constant 4.471500e-02 : f32
    %227 = vector.broadcast %cst_63 : f32 to vector<16x128xf32>
    %228 = arith.mulf %227, %224 : vector<16x128xf32>
    %229 = arith.mulf %228, %224 : vector<16x128xf32>
    %230 = arith.mulf %229, %224 : vector<16x128xf32>
    %231 = arith.addf %224, %230 : vector<16x128xf32>
    %cst_64 = arith.constant 0.797884583 : f32
    %232 = vector.broadcast %cst_64 : f32 to vector<16x128xf32>
    %233 = arith.mulf %232, %231 : vector<16x128xf32>
    %234 = math.tanh %233 : vector<16x128xf32>
    %cst_65 = arith.constant 1.000000e+00 : f32
    %235 = vector.broadcast %cst_65 : f32 to vector<16x128xf32>
    %236 = arith.addf %235, %234 : vector<16x128xf32>
    %237 = arith.mulf %226, %236 : vector<16x128xf32>
    %cst_66 = arith.constant dense<0.000000e+00> : vector<16x32xf32>
    %238 = tpu.matmul %237, %7, %cst_66 {dimension_numbers = #tpu.dot_dimension_numbers<[1], [0], [0], [1], [0, 0, 1, 1], [], []>} : vector<16x128xf32>, vector<128x32xf32>, vector<16x32xf32> -> vector<16x32xf32>
    %239 = vector.broadcast %15 : vector<1x32xf32> to vector<16x32xf32>
    %240 = arith.addf %238, %239 : vector<16x32xf32>
    %241 = arith.addf %199, %240 : vector<16x32xf32>
    %c0_67 = arith.constant 0 : index
    %c0_68 = arith.constant 0 : index
    %242 = vector.load %arg5[%c0_67, %c0_68] : memref<16x32xf32, #tpu.memory_space<vmem>>, vector<16x32xf32>
    tpu.vector_store %arg5[%c0_67, %c0_68], %241 {strides = array<i32>} : memref<16x32xf32, #tpu.memory_space<vmem>>, vector<16x32xf32>,
    return
  }
  func.func @transform_0(%arg0: i32) -> (i32, i32) {
    %c0_i32 = arith.constant 0 : i32
    %c0_i32_0 = arith.constant 0 : i32
    %c0_i32_1 = arith.constant 0 : i32
    return %c0_i32, %c0_i32_0 : i32, i32
  }
  func.func @transform_1(%arg0: i32) -> (i32, i32, i32) {
    %c0_i32 = arith.constant 0 : i32
    %c0_i32_0 = arith.constant 0 : i32
    %c0_i32_1 = arith.constant 0 : i32
    return %arg0, %c0_i32, %c0_i32_0 : i32, i32, i32
  }
  func.func @transform_2(%arg0: i32) -> (i32, i32, i32) {
    %c0_i32 = arith.constant 0 : i32
    %c0_i32_0 = arith.constant 0 : i32
    %c0_i32_1 = arith.constant 0 : i32
    return %arg0, %c0_i32, %c0_i32_0 : i32, i32, i32
  }
  func.func @transform_3(%arg0: i32) -> (i32, i32, i32) {
    %c0_i32 = arith.constant 0 : i32
    %c0_i32_0 = arith.constant 0 : i32
    %c0_i32_1 = arith.constant 0 : i32
    return %arg0, %c0_i32, %c0_i32_0 : i32, i32, i32
  }
  func.func @transform_4(%arg0: i32) -> (i32, i32) {
    %c0_i32 = arith.constant 0 : i32
    %c0_i32_0 = arith.constant 0 : i32
    %c0_i32_1 = arith.constant 0 : i32
    return %c0_i32, %c0_i32_0 : i32, i32
  }
}

</mosaic_0001>

<bundles_post_ra>
// kernel: mae_encoder_layers.1
= control target key start
LH: loop header
LB: loop body
LE: loop exit
PB: predicated region body
PF: predicated region fallthrough
CT: control target
= control target key end

     0   :  { %vm24_vm0 = vcmask 261120   ;;  %s3135_s0 = inlined_call_operand.vmem [shape: f32[16,32], index: 0, kind: input, shape index: {}]   ;;  %s3136_s1 = inlined_call_operand.vmem [shape: f32[1,32,256], index: 1, kind: input, shape index: {}]   ;;  %s3137_s2 = inlined_call_operand.vmem [shape: f32[1,128,32], index: 2, kind: input, shape index: {}]   ;;  %s3138_s3 = inlined_call_operand.vmem [shape: f32[1,8,128], index: 3, kind: input, shape index: {}]   ;;  %s3139_s4 = inlined_call_operand.hbm [shape: f32[16,32], index: 4, kind: output, shape index: {}]  }
   0x1   :  { %v22_v0 = vld [vmem:[%s3135_s0] sm:$0xff]  ;;  %v23_v1 = vld [vmem:[%s3135_s0 + $0x8] sm:$0xff] }
   0x2   :  { %9 = vsyncpa [#allocation3], 0  ;;  %25 = vst.msk [vmem:[#allocation2] sm:$0xff] %vm24_vm0, %v22_v0  ;;  %v2799_v10 = vld [vmem:[%s3136_s1 + $0x30] sm:$0xff]  ;;  %v2804_v11 = vld [vmem:[%s3136_s1 + $0x20] sm:$0xff]  ;;  %v86_v27 = vlaneseq  ;;  %v2732_v45 = vmov 0.0  }
   0x3   :  { %26 = vst.msk [vmem:[#allocation2 + $0x8] sm:$0xff] %vm24_vm0, %v23_v1  ;;  %2472 = vmatprep.subr.mxu0 %v2799_v10  ;;  %v2811_v12 = vld [vmem:[%s3136_s1 + $0x10] sm:$0xff]  ;;  %v2820_v13 = vld [vmem:[%s3136_s1] sm:$0xff]  ;;  %2508 = vmatprep.subr.mxu1 %v2732_v45  ;;  %vm2733_vm1 = vmmov 0   ;;  %s2735_s28 = smov 88   ;;  %vm186_vm2 = vcmask 64512  }
   0x4   :  { %2473 = vmatpush3.msra.mxu0 %v2799_v10  ;;  %v2824_v29 = vshrl.u32 %v86_v27, 7  ;;  %v2830_v31 = vld [vmem:[%s3138_s3] sm:$0xff]  ;;  %2510 = vmatprep.mubr.msk.f32.mxu1 %vm2733_vm1, %v2732_v45  ;;  %s2734_s3 = smov 96   ;;  %s2736_s29 = smov 64  }
   0x5   :  { %2474 = vmatprep.subr.mxu0 %v2804_v11  ;;  %s2737_s30 = smov 120   ;;  %s2738_s5 = smov 56  }
   0x6   :  { %2475 = vmatpush3.msra.mxu0 %v2804_v11  ;;  %v88_v30 = vsub.s32 0, %v2824_v29  ;;  %v94_v32 = vsub.s32 1, %v2824_v29  ;;  %v100_v46 = vsub.s32 7, %v2824_v29  ;;  %s2739_s6 = smov 80   ;;  %s2740_s7 = smov 32  }
   0x7   :  { %2476 = vmatprep.subr.mxu0 %v2811_v12  ;;  %s2741_s8 = smov 112   ;;  %s2742_s9 = smov 48  }
   0x8   :  { %2477 = vmatpush3.msra.mxu0 %v2811_v12  ;;  %v89_v34 = vrot.slane %v2830_v31, %v88_v30  ;;  %v95_v37 = vrot.slane %v2830_v31, %v94_v32  ;;  %v101_v47 = vrot.slane %v2830_v31, %v100_v46  ;;  %s2743_s10 = smov 72   ;;  %s2744_s11 = smov 104  }
   0x9   :  { %v2782_v2 = vld [vmem:[#allocation2] sm:$0xff]  ;;  %2478 = vmatprep.subr.mxu0 %v2820_v13  ;;  %s2745_s12 = smov 40  }
   0xa   :  { %v2784_v3 = vld [vmem:[#allocation2 + $0x8] sm:$0xff]  ;;  %v55_v4 = vsel %vm24_vm0, %v2782_v2, 0.0  ;;  %v64_v5 = vmul.f32 %v2782_v2, %v2782_v2  ;;  %2479 = vmatpush3.msra.mxu0 %v2820_v13 }
   0xb   :  { %v65_v6 = vmul.f32 %v2784_v3, %v2784_v3  ;;  %56 = vadd.xlane.f32.xlu0 %v55_v4  ;;  %v58_v8 = vsel %vm24_vm0, %v2784_v3, 0.0  ;;  %2483 = vmatprep.subr.mxu0 %v2732_v45 }
   0xc   :  { %v66_v7 = vsel %vm24_vm0, %v64_v5, 0.0 }
   0xd   :  { %67 = vadd.xlane.f32.xlu1 %v66_v7  ;;  %v69_v9 = vsel %vm24_vm0, %v65_v6, 0.0 }
   0xf   :  { %59 = vadd.xlane.f32.xlu0 %v58_v8 }
  0x11   :  { %70 = vadd.xlane.f32.xlu1 %v69_v9 }
  0x94   :  { %v57_v14 = vpop.xlane.xlu0 %56 }
  0x95   :  { %v62_v15 = vmul.f32 0.03125, %v57_v14 }
  0x96   :  { %v68_v16 = vpop.xlane.xlu1 %67 }
  0x97   :  { %v74_v17 = vmul.f32 %v62_v15, %v62_v15  ;;  %v72_v18 = vmul.f32 0.03125, %v68_v16  ;;  %v78_v33 = vsub.f32 %v2782_v2, %v62_v15 }
  0x98   :  { %v60_v19 = vpop.xlane.xlu0 %59 }
  0x99   :  { %v76_v20 = vsub.f32 %v72_v18, %v74_v17  ;;  %v63_v21 = vmul.f32 0.03125, %v60_v19 }
  0x9a   :  { %v71_v22 = vpop.xlane.xlu1 %70 }
  0x9b   :  { %v80_v23 = vadd.f32 1e-05, %v76_v20  ;;  %v75_v24 = vmul.f32 %v63_v21, %v63_v21  ;;  %v73_v25 = vmul.f32 0.03125, %v71_v22  ;;  %v79_v38 = vsub.f32 %v2784_v3, %v63_v21 }
  0x9d   :  { %2666 = vrsqrt.f32 %v80_v23  ;;  %v77_v26 = vsub.f32 %v73_v25, %v75_v24 }
  0x9f   :  { %v81_v28 = vadd.f32 1e-05, %v77_v26 }
  0xa1   :  { %2668 = vrsqrt.f32 %v81_v28 }
  0xaa   :  { %v2667_v35 = vpop.eup %2666 }
  0xab   :  { %v84_v36 = vmul.f32 %v2667_v35, %v78_v33 }
  0xad   :  { %v90_v39 = vmul.f32 %v89_v34, %v84_v36 }
  0xae   :  { %v2669_v40 = vpop.eup %2668 }
  0xaf   :  { %v85_v41 = vmul.f32 %v2669_v40, %v79_v38  ;;  %v96_v42 = vadd.f32 %v95_v37, %v90_v39 }
  0xb1   :  { %v91_v43 = vmul.f32 %v89_v34, %v85_v41  ;;  %2480 = vmatprep.mubr.msk.f32.mxu0 %vm24_vm0, %v96_v42 }
  0xb3   :  { %v97_v44 = vadd.f32 %v95_v37, %v91_v43 }
  0xb5   :  { %2481 = vmatmul.mubr.msk.f32.vlgmr.msra.gmra.mxu0 %vm24_vm0, %v97_v44 }
  0xb6   :  { %2485 = vmatprep.mubr.msk.f32.mxu0 %vm2733_vm1, %v2732_v45 }
 0x175   :  { %v2482_v48 = vpop.f32.mrf.mxu0 }
 0x176   :  { %v2847_v49 = vadd.f32 %v2482_v48, %v101_v47 }
 0x177   :  { %v174_v50 = vpop.f32.mrf.mxu0 }
 0x178   :  { %v2849_v51 = vadd.f32 %v174_v50, %v101_v47 }
 0x17a   :  { %184 = vrot.lane.b32.xlu0 %v2849_v51, %s2734_s3 }
 0x17e   :  { %350 = vrot.lane.b32.xlu0 %v2849_v51, %s2735_s28 }
 0x1ec   :  { %v185_v52 = vpop.permute.xlu0 %184 }
 0x1ed   :  { %2484 = vmatpush3.xpose.msk.msra.mxu0 %vm186_vm2, %v185_v52 }
 0x1ee   :  { %2488 = vmatprep.subr.mxu0 %v2732_v45 }
 0x1f0   :  { %2486 = vmatmul.mubr.msk.f32.vlgmr.msra.gmra.mxu0 %vm186_vm2, %v2849_v51  ;;  %v351_v1 = vpop.permute.xlu0 %350 }
 0x1f1   :  { %2490 = vmatprep.mubr.msk.f32.mxu0 %vm2733_vm1, %v2732_v45 }
 0x2b0   :  { %v257_v53 = vpop.f32.mrf.mxu0 }
 0x2b1   :  { %v261_v54 = vsel %vm186_vm2, %v257_v53, -inf }
 0x2b2   :  { %262 = vmax.xlane.f32.xlu1 %v261_v54  ;;  %v2487_v55 = vpop.f32.mrf.mxu0 }
 0x2c3   :  { %272 = vrot.lane.b32.xlu1 %v2849_v51, %s2736_s29 }
 0x33b   :  { %v263_v56 = vpop.xlane.xlu1 %262 }
 0x33c   :  { %v264_v57 = vsub.f32 %v257_v53, %v263_v56 }
 0x33e   :  { %v265_v58 = vmul.f32 1.442695, %v264_v57 }
 0x33f   :  { %v273_v59 = vpop.permute.xlu1 %272 }
 0x340   :  { %2670 = vpow2.f32 %v265_v58  ;;  %2489 = vmatpush3.msra.mxu0 %v273_v59 }
 0x341   :  { %2493 = vmatprep.subr.mxu0 %v2732_v45 }
 0x34d   :  { %v2671_v60 = vpop.eup %2670 }
 0x34e   :  { %v267_v61 = vsel %vm186_vm2, %v2671_v60, 0.0 }
 0x34f   :  { %268 = vadd.xlane.f32.xlu1 %v267_v61 }
 0x360   :  { %348 = vrot.lane.b32.xlu1 %v2849_v51, %s2737_s30 }
 0x3d8   :  { %v269_v62 = vpop.xlane.xlu1 %268 }
 0x3d9   :  { %2672 = vrcp.f32 %v269_v62 }
 0x3dc   :  { %v349_v4 = vpop.permute.xlu1 %348 }
 0x3e6   :  { %v2673_v63 = vpop.eup %2672 }
 0x3e7   :  { %v271_v0 = vmul.f32 %v2673_v63, %v2671_v60 }
 0x3e9   :  { %2491 = vmatmul.mubr.msk.f32.vlgmr.msra.gmra.mxu0 %vm186_vm2, %v271_v0 }
 0x3ea   :  { %2494 = vmatpush3.xpose.msk.msra.mxu0 %vm186_vm2, %v351_v1  ;;  %2495 = vmatprep.mubr.msk.f32.mxu0 %vm2733_vm1, %v2732_v45 }
 0x3eb   :  { %2498 = vmatprep.subr.mxu0 %v2732_v45 }
 0x3ed   :  { %2496 = vmatmul.mubr.msk.f32.vlgmr.msra.gmra.mxu0 %vm186_vm2, %v349_v4 }
 0x3ee   :  { %2500 = vmatprep.mubr.msk.f32.mxu0 %vm2733_vm1, %v2732_v45 }
 0x4a9   :  { %v344_v5 = vpop.f32.mrf.mxu0 }
 0x4ab   :  { %v2492_v6 = vpop.f32.mrf.mxu0 }
 0x4ad   :  { %v422_v7 = vpop.f32.mrf.mxu0 }
 0x4ae   :  { %v426_v8 = vsel %vm186_vm2, %v422_v7, -inf }
 0x4af   :  { %427 = vmax.xlane.f32.xlu0 %v426_v8  ;;  %v2497_v9 = vpop.f32.mrf.mxu0 }
 0x4c5   :  { %437 = vrot.lane.b32.xlu0 %v2849_v51, %s2738_s5 }
 0x4c9   :  { %669 = vrot.lane.b32.xlu0 %v2849_v51, %s2739_s6 }
 0x538   :  { %v428_v14 = vpop.xlane.xlu0 %427 }
 0x539   :  { %v429_v15 = vsub.f32 %v422_v7, %v428_v14 }
 0x53b   :  { %v430_v16 = vmul.f32 1.442695, %v429_v15 }
 0x53c   :  { %v438_v17 = vpop.permute.xlu0 %437 }
 0x53d   :  { %2674 = vpow2.f32 %v430_v16  ;;  %2499 = vmatpush3.msra.mxu0 %v438_v17 }
 0x53e   :  { %2503 = vmatprep.subr.mxu0 %v2732_v45 }
 0x540   :  { %v670_v24 = vpop.permute.xlu0 %669 }
 0x54a   :  { %v2675_v18 = vpop.eup %2674 }
 0x54b   :  { %v432_v19 = vsel %vm186_vm2, %v2675_v18, 0.0 }
 0x54c   :  { %433 = vadd.xlane.f32.xlu1 %v432_v19 }
 0x55d   :  { %514 = vrot.lane.b32.xlu1 %v2811_v12, %s2740_s7 }
 0x561   :  { %667 = vrot.lane.b32.xlu1 %v2849_v51, %s2741_s8 }
 0x565   :  { %756 = vrot.lane.b32.xlu1 %v2849_v51, %s2742_s9 }
 0x5d5   :  { %v434_v20 = vpop.xlane.xlu1 %433 }
 0x5d6   :  { %2676 = vrcp.f32 %v434_v20 }
 0x5d9   :  { %v2889_v23 = vpop.permute.xlu1 %514 }
 0x5dd   :  { %v668_v26 = vpop.permute.xlu1 %667 }
 0x5e1   :  { %v757_v38 = vpop.permute.xlu1 %756 }
 0x5e3   :  { %v2677_v21 = vpop.eup %2676 }
 0x5e4   :  { %v436_v22 = vmul.f32 %v2677_v21, %v2675_v18 }
 0x5e6   :  { %2501 = vmatmul.mubr.msk.f32.vlgmr.msra.gmra.mxu0 %vm186_vm2, %v436_v22 }
 0x5e7   :  { %2504 = vmatpush3.msra.mxu0 %v2889_v23  ;;  %2505 = vmatprep.mubr.msk.f32.mxu0 %vm2733_vm1, %v2732_v45 }
 0x5e8   :  { %2513 = vmatprep.subr.mxu0 %v2732_v45 }
 0x6a6   :  { %v509_v12 = vpop.f32.mrf.mxu0 }
 0x6a7   :  { %2506 = vmatmul.mubr.msk.f32.vlgmr.msra.gmra.mxu0 %vm186_vm2, %v509_v12 }
 0x6a8   :  { %2514 = vmatpush3.xpose.msk.msra.mxu0 %vm186_vm2, %v670_v24  ;;  %v2502_v25 = vpop.f32.mrf.mxu0  ;;  %2515 = vmatprep.mubr.msk.f32.mxu0 %vm2733_vm1, %v2732_v45 }
 0x6a9   :  { %2523 = vmatprep.subr.mxu0 %v2732_v45 }
 0x6ab   :  { %2516 = vmatmul.mubr.msk.f32.vlgmr.msra.gmra.mxu0 %vm186_vm2, %v668_v26 }
 0x6ac   :  { %2525 = vmatprep.mubr.msk.f32.mxu0 %vm2733_vm1, %v2732_v45 }
 0x767   :  { %v2904_v27 = vpop.f32.mrf.mxu0 }
 0x769   :  { %v2507_v28 = vpop.f32.mrf.mxu0 }
 0x76b   :  { %v741_v30 = vpop.f32.mrf.mxu0 }
 0x76c   :  { %v745_v32 = vsel %vm186_vm2, %v741_v30, -inf }
 0x76d   :  { %746 = vmax.xlane.f32.xlu0 %v745_v32  ;;  %v2517_v33 = vpop.f32.mrf.mxu0 }
 0x783   :  { %591 = vrot.lane.b32.xlu0 %v2820_v13, %s2740_s7 }
 0x787   :  { %912 = vrot.lane.b32.xlu0 %v2849_v51, %s2743_s10 }
 0x7f6   :  { %v747_v34 = vpop.xlane.xlu0 %746 }
 0x7f7   :  { %v748_v35 = vsub.f32 %v741_v30, %v747_v34 }
 0x7f9   :  { %v749_v36 = vmul.f32 1.442695, %v748_v35 }
 0x7fa   :  { %v2911_v37 = vpop.permute.xlu0 %591 }
 0x7fb   :  { %2678 = vpow2.f32 %v749_v36  ;;  %2509 = vmatpush3.msra.mxu1 %v2911_v37 }
 0x7fc   :  { %2511 = vmatmul.mubr.msk.f32.vlgmr.msra.gmra.mxu1 %vm186_vm2, %v344_v5  ;;  %2518 = vmatprep.subr.mxu1 %v2732_v45 }
 0x7fd   :  { %2519 = vmatpush3.msra.mxu1 %v757_v38  ;;  %2520 = vmatprep.mubr.msk.f32.mxu1 %vm2733_vm1, %v2732_v45 }
 0x7fe   :  { %2528 = vmatprep.subr.mxu1 %v2732_v45  ;;  %v913_v43 = vpop.permute.xlu0 %912 }
 0x808   :  { %v2679_v13 = vpop.eup %2678 }
 0x809   :  { %v751_v39 = vsel %vm186_vm2, %v2679_v13, 0.0 }
 0x80a   :  { %752 = vadd.xlane.f32.xlu1 %v751_v39 }
 0x81b   :  { %910 = vrot.lane.b32.xlu1 %v2849_v51, %s2744_s11 }
 0x81f   :  { %999 = vrot.lane.b32.xlu1 %v2849_v51, %s2745_s12 }
 0x893   :  { %v753_v40 = vpop.xlane.xlu1 %752 }
 0x894   :  { %2680 = vrcp.f32 %v753_v40 }
 0x897   :  { %v911_v44 = vpop.permute.xlu1 %910 }
 0x89b   :  { %v1000_v58 = vpop.permute.xlu1 %999 }
 0x8a1   :  { %v2681_v41 = vpop.eup %2680 }
 0x8a2   :  { %v755_v42 = vmul.f32 %v2681_v41, %v2679_v13 }
 0x8a4   :  { %2521 = vmatmul.mubr.msk.f32.vlgmr.msra.gmra.mxu1 %vm186_vm2, %v755_v42 }
 0x8a5   :  { %2529 = vmatpush3.xpose.msk.msra.mxu1 %vm186_vm2, %v913_v43  ;;  %2530 = vmatprep.mubr.msk.f32.mxu1 %vm2733_vm1, %v2732_v45 }
 0x8a6   :  { %2538 = vmatprep.subr.mxu1 %v2732_v45 }
 0x8a8   :  { %2531 = vmatmul.mubr.msk.f32.vlgmr.msra.gmra.mxu1 %vm186_vm2, %v911_v44 }
 0x8a9   :  { %2540 = vmatprep.mubr.msk.f32.mxu1 %vm2733_vm1, %v2732_v45 }
 0x8bc   :  { %v663_v46 = vpop.f32.mrf.mxu1 }
 0x8bd   :  { %v664_v4 = vadd.f32 %v663_v46, %v2904_v27 }
 0x8be   :  { %v2512_v47 = vpop.f32.mrf.mxu1 }
 0x964   :  { %v828_v48 = vpop.f32.mrf.mxu1 }
 0x966   :  { %v2522_v50 = vpop.f32.mrf.mxu1 }
 0x968   :  { %v984_v51 = vpop.f32.mrf.mxu1 }
 0x969   :  { %v988_v52 = vsel %vm186_vm2, %v984_v51, -inf }
 0x96a   :  { %989 = vmax.xlane.f32.xlu0 %v988_v52  ;;  %v2532_v53 = vpop.f32.mrf.mxu1 }
 0x980   :  { %833 = vrot.lane.b32.xlu0 %v2804_v11, %s2740_s7 }
 0x984   :  { %1154 = vrot.lane.b32.xlu0 %v2847_v49, %s2734_s3 }
 0x988   :  { %1317 = vrot.lane.b32.xlu0 %v2847_v49, %s2737_s30 }
 0x9f3   :  { %v990_v54 = vpop.xlane.xlu0 %989 }
 0x9f4   :  { %v991_v55 = vsub.f32 %v984_v51, %v990_v54 }
 0x9f6   :  { %v992_v56 = vmul.f32 1.442695, %v991_v55 }
 0x9f7   :  { %v2939_v57 = vpop.permute.xlu0 %833 }
 0x9f8   :  { %2682 = vpow2.f32 %v992_v56  ;;  %2524 = vmatpush3.msra.mxu0 %v2939_v57 }
 0x9f9   :  { %2526 = vmatmul.mubr.msk.f32.vlgmr.msra.gmra.mxu0 %vm186_vm2, %v828_v48  ;;  %2533 = vmatprep.subr.mxu0 %v2732_v45 }
 0x9fa   :  { %2534 = vmatpush3.msra.mxu0 %v1000_v58  ;;  %2535 = vmatprep.mubr.msk.f32.mxu0 %vm2733_vm1, %v2732_v45 }
 0x9fb   :  { %2543 = vmatprep.subr.mxu0 %v2732_v45  ;;  %v1155_v63 = vpop.permute.xlu0 %1154 }
 0x9ff   :  { %v1318_v1 = vpop.permute.xlu0 %1317 }
 0xa05   :  { %v2683_v11 = vpop.eup %2682 }
 0xa06   :  { %v994_v59 = vsel %vm186_vm2, %v2683_v11, 0.0 }
 0xa07   :  { %995 = vadd.xlane.f32.xlu1 %v994_v59 }
 0xa18   :  { %1319 = vrot.lane.b32.xlu1 %v2847_v49, %s2735_s28 }
 0xa90   :  { %v996_v60 = vpop.xlane.xlu1 %995 }
 0xa91   :  { %2684 = vrcp.f32 %v996_v60 }
 0xa94   :  { %v1320_v0 = vpop.permute.xlu1 %1319 }
 0xa9e   :  { %v2685_v61 = vpop.eup %2684 }
 0xa9f   :  { %v998_v62 = vmul.f32 %v2685_v61, %v2683_v11 }
 0xaa1   :  { %2536 = vmatmul.mubr.msk.f32.vlgmr.msra.gmra.mxu0 %vm186_vm2, %v998_v62 }
 0xaa2   :  { %2544 = vmatpush3.xpose.msk.msra.mxu0 %vm186_vm2, %v1155_v63  ;;  %2545 = vmatprep.mubr.msk.f32.mxu0 %vm2733_vm1, %v2732_v45 }
 0xaa3   :  { %2553 = vmatprep.subr.mxu0 %v2732_v45 }
 0xaa5   :  { %2546 = vmatmul.mubr.msk.f32.vlgmr.msra.gmra.mxu0 %vm186_vm2, %v2847_v49 }
 0xaa6   :  { %2554 = vmatpush3.xpose.msk.msra.mxu0 %vm186_vm2, %v1320_v0  ;;  %2555 = vmatprep.mubr.msk.f32.mxu0 %vm2733_vm1, %v2732_v45 }
 0xaa7   :  { %2563 = vmatprep.subr.mxu0 %v2732_v45 }
 0xaa9   :  { %2556 = vmatmul.mubr.msk.f32.vlgmr.msra.gmra.mxu0 %vm186_vm2, %v1318_v1 }
 0xaaa   :  { %2564 = vmatpush3.msra.mxu0 %v2889_v23  ;;  %2565 = vmatprep.mubr.msk.f32.mxu0 %vm2733_vm1, %v2732_v45 }
 0xaab   :  { %2573 = vmatprep.subr.mxu0 %v2732_v45 }
 0xab9   :  { %v905_v5 = vpop.f32.mrf.mxu0 }
 0xaba   :  { %v909_v6 = vadd.f32 %v905_v5, %v664_v4  ;;  %v2108_v5 = vsub.s32 2, %v2824_v29 }
 0xabb   :  { %v2527_v7 = vpop.f32.mrf.mxu0 }
 0xb61   :  { %v1071_v8 = vpop.f32.mrf.mxu0 }
 0xb63   :  { %v2537_v9 = vpop.f32.mrf.mxu0 }
 0xb65   :  { %v1226_v14 = vpop.f32.mrf.mxu0 }
 0xb66   :  { %v1230_v15 = vsel %vm186_vm2, %v1226_v14, -inf }
 0xb67   :  { %1231 = vmax.xlane.f32.xlu1 %v1230_v15  ;;  %v2547_v16 = vpop.f32.mrf.mxu0 }
 0xb69   :  { %v1391_v17 = vpop.f32.mrf.mxu0 }
 0xb6a   :  { %v1395_v18 = vsel %vm186_vm2, %v1391_v17, -inf }
 0xb6b   :  { %1396 = vmax.xlane.f32.xlu0 %v1395_v18  ;;  %v2557_v19 = vpop.f32.mrf.mxu0 }
 0xb78   :  { %1076 = vrot.lane.b32.xlu1 %v2799_v10, %s2740_s7 }
 0xb7c   :  { %1406 = vrot.lane.b32.xlu1 %v2847_v49, %s2738_s5 }
 0xb80   :  { %1630 = vrot.lane.b32.xlu1 %v2847_v49, %s2739_s6 }
 0xb84   :  { %1628 = vrot.lane.b32.xlu1 %v2847_v49, %s2741_s8 }
 0xbf0   :  { %v1232_v20 = vpop.xlane.xlu1 %1231 }
 0xbf1   :  { %v1233_v21 = vsub.f32 %v1226_v14, %v1232_v20 }
 0xbf3   :  { %v1234_v22 = vmul.f32 1.442695, %v1233_v21 }
 0xbf4   :  { %v2977_v23 = vpop.permute.xlu1 %1076  ;;  %v1397_v12 = vpop.xlane.xlu0 %1396 }
 0xbf5   :  { %2686 = vpow2.f32 %v1234_v22  ;;  %v1398_v24 = vsub.f32 %v1391_v17, %v1397_v12  ;;  %2539 = vmatpush3.msra.mxu1 %v2977_v23 }
 0xbf6   :  { %2541 = vmatmul.mubr.msk.f32.vlgmr.msra.gmra.mxu1 %vm186_vm2, %v1071_v8  ;;  %2548 = vmatprep.subr.mxu1 %v2732_v45 }
 0xbf7   :  { %v1399_v10 = vmul.f32 1.442695, %v1398_v24  ;;  %2550 = vmatprep.mubr.msk.f32.mxu1 %vm2733_vm1, %v2732_v45 }
 0xbf8   :  { %v1407_v36 = vpop.permute.xlu1 %1406 }
 0xbf9   :  { %2688 = vpow2.f32 %v1399_v10 }
 0xbfc   :  { %v1631_v43 = vpop.permute.xlu1 %1630 }
 0xc00   :  { %v1629_v47 = vpop.permute.xlu1 %1628 }
 0xc02   :  { %v2687_v25 = vpop.eup %2686 }
 0xc03   :  { %v1236_v26 = vsel %vm186_vm2, %v2687_v25, 0.0 }
 0xc04   :  { %1237 = vadd.xlane.f32.xlu0 %v1236_v26 }
 0xc06   :  { %v2689_v27 = vpop.eup %2688 }
 0xc07   :  { %v1401_v28 = vsel %vm186_vm2, %v2689_v27, 0.0 }
 0xc08   :  { %1402 = vadd.xlane.f32.xlu0 %v1401_v28 }
 0xc1e   :  { %1241 = vrot.lane.b32.xlu0 %v2847_v49, %s2736_s29 }
 0xc8d   :  { %v1238_v30 = vpop.xlane.xlu0 %1237 }
 0xc8e   :  { %2690 = vrcp.f32 %v1238_v30 }
 0xc91   :  { %v1403_v32 = vpop.xlane.xlu0 %1402 }
 0xc92   :  { %2692 = vrcp.f32 %v1403_v32 }
 0xc95   :  { %v1242_v33 = vpop.permute.xlu0 %1241 }
 0xc96   :  { %2549 = vmatpush3.msra.mxu1 %v1242_v33 }
 0xc97   :  { %2558 = vmatprep.subr.mxu1 %v2732_v45 }
 0xc9b   :  { %v2691_v34 = vpop.eup %2690 }
 0xc9c   :  { %v1240_v35 = vmul.f32 %v2691_v34, %v2687_v25 }
 0xc9e   :  { %2551 = vmatmul.mubr.msk.f32.vlgmr.msra.gmra.mxu1 %vm186_vm2, %v1240_v35 }
 0xc9f   :  { %v2693_v38 = vpop.eup %2692  ;;  %2559 = vmatpush3.msra.mxu1 %v1407_v36  ;;  %2560 = vmatprep.mubr.msk.f32.mxu1 %vm2733_vm1, %v2732_v45  ;;  %v2146_v36 = vsub.s32 3, %v2824_v29 }
 0xca0   :  { %2568 = vmatprep.subr.mxu1 %v2732_v45  ;;  %v1405_v13 = vmul.f32 %v2693_v38, %v2689_v27 }
 0xca2   :  { %2561 = vmatmul.mubr.msk.f32.vlgmr.msra.gmra.mxu1 %vm186_vm2, %v1405_v13 }
 0xca3   :  { %2569 = vmatpush3.msra.mxu1 %v2911_v37  ;;  %2570 = vmatprep.mubr.msk.f32.mxu1 %vm2733_vm1, %v2732_v45 }
 0xca4   :  { %2578 = vmatprep.subr.mxu1 %v2732_v45 }
 0xcb6   :  { %v1148_v39 = vpop.f32.mrf.mxu1 }
 0xcb7   :  { %v1152_v40 = vadd.f32 %v1148_v39, %v909_v6  ;;  %v2109_v6 = vrot.slane %v2830_v31, %v2108_v5  ;;  %v2147_v39 = vrot.slane %v2830_v31, %v2146_v36 }
 0xcb8   :  { %v2542_v41 = vpop.f32.mrf.mxu1 }
 0xcb9   :  { %v2110_v8 = vadd.f32 %v2109_v6, %v1152_v40  ;;  %v2152_v40 = vsub.s32 4, %v2824_v29 }
 0xcbb   :  { %v3035_v15 = vadd.f32 %v2110_v8, %v2782_v2 }
 0xcbd   :  { %v2114_v18 = vsel %vm24_vm0, %v3035_v15, 0.0  ;;  %v2122_v19 = vmul.f32 %v3035_v15, %v3035_v15 }
 0xcbf   :  { %v2124_v20 = vsel %vm24_vm0, %v2122_v19, 0.0  ;;  %v47_v19 = vld [vmem:[%s3137_s2 + $0x50] sm:$0xff] }
 0xd5e   :  { %v1313_v42 = vpop.f32.mrf.mxu1 }
 0xd5f   :  { %2571 = vmatmul.mubr.msk.f32.vlgmr.msra.gmra.mxu1 %vm186_vm2, %v1313_v42  ;;  %v2153_v42 = vrot.slane %v2830_v31, %v2152_v40 }
 0xd60   :  { %v2552_v44 = vpop.f32.mrf.mxu1  ;;  %2580 = vmatprep.mubr.msk.f32.mxu1 %vm2733_vm1, %v2732_v45 }
 0xd62   :  { %v1478_v46 = vpop.f32.mrf.mxu1 }
 0xd63   :  { %2566 = vmatmul.mubr.msk.f32.vlgmr.msra.gmra.mxu0 %vm186_vm2, %v1478_v46 }
 0xd64   :  { %2574 = vmatpush3.xpose.msk.msra.mxu0 %vm186_vm2, %v1631_v43  ;;  %v2562_v37 = vpop.f32.mrf.mxu1  ;;  %2575 = vmatprep.mubr.msk.f32.mxu0 %vm2733_vm1, %v2732_v45 }
 0xd65   :  { %2583 = vmatprep.subr.mxu0 %v2732_v45 }
 0xd67   :  { %2576 = vmatmul.mubr.msk.f32.vlgmr.msra.gmra.mxu0 %vm186_vm2, %v1629_v47 }
 0xd68   :  { %2584 = vmatpush3.msra.mxu0 %v2939_v57  ;;  %2585 = vmatprep.mubr.msk.f32.mxu0 %vm2733_vm1, %v2732_v45 }
 0xd69   :  { %2593 = vmatprep.subr.mxu0 %v2732_v45 }
 0xe1f   :  { %v1624_v48 = vpop.f32.mrf.mxu1 }
 0xe21   :  { %v2572_v50 = vpop.f32.mrf.mxu1 }
 0xe23   :  { %v1551_v51 = vpop.f32.mrf.mxu0 }
 0xe24   :  { %v1625_v52 = vadd.f32 %v1624_v48, %v1551_v51 }
 0xe25   :  { %v2567_v53 = vpop.f32.mrf.mxu0 }
 0xe27   :  { %v1702_v54 = vpop.f32.mrf.mxu0 }
 0xe28   :  { %v1706_v55 = vsel %vm186_vm2, %v1702_v54, -inf }
 0xe29   :  { %1707 = vmax.xlane.f32.xlu0 %v1706_v55  ;;  %v2577_v56 = vpop.f32.mrf.mxu0 }
 0xe3f   :  { %1717 = vrot.lane.b32.xlu0 %v2847_v49, %s2742_s9 }
 0xe43   :  { %1867 = vrot.lane.b32.xlu0 %v2847_v49, %s2744_s11 }
 0xeb2   :  { %v1708_v57 = vpop.xlane.xlu0 %1707 }
 0xeb3   :  { %v1709_v58 = vsub.f32 %v1702_v54, %v1708_v57  ;;  %v36_v57 = vld [vmem:[%s3136_s1 + $0x38] sm:$0xff] }
 0xeb5   :  { %v1710_v11 = vmul.f32 1.442695, %v1709_v58  ;;  %v34_v58 = vld [vmem:[%s3136_s1 + $0x28] sm:$0xff] }
 0xeb6   :  { %v1718_v59 = vpop.permute.xlu0 %1717 }
 0xeb7   :  { %2694 = vpow2.f32 %v1710_v11  ;;  %2579 = vmatpush3.msra.mxu1 %v1718_v59  ;;  %v30_v11 = vld [vmem:[%s3136_s1 + $0x8] sm:$0xff] }
 0xeb8   :  { %2588 = vmatprep.subr.mxu1 %v2732_v45 }
 0xeba   :  { %v1868_v4 = vpop.permute.xlu0 %1867 }
 0xec4   :  { %v2695_v60 = vpop.eup %2694 }
 0xec5   :  { %v1712_v61 = vsel %vm186_vm2, %v2695_v60, 0.0 }
 0xec6   :  { %1713 = vadd.xlane.f32.xlu1 %v1712_v61 }
 0xed7   :  { %1869 = vrot.lane.b32.xlu1 %v2847_v49, %s2743_s10 }
 0xf4f   :  { %v1714_v62 = vpop.xlane.xlu1 %1713 }
 0xf50   :  { %2696 = vrcp.f32 %v1714_v62 }
 0xf53   :  { %v1870_v1 = vpop.permute.xlu1 %1869 }
 0xf5d   :  { %v2697_v63 = vpop.eup %2696 }
 0xf5e   :  { %v1716_v0 = vmul.f32 %v2697_v63, %v2695_v60 }
 0xf60   :  { %2581 = vmatmul.mubr.msk.f32.vlgmr.msra.gmra.mxu1 %vm186_vm2, %v1716_v0 }
 0xf61   :  { %2589 = vmatpush3.xpose.msk.msra.mxu1 %vm186_vm2, %v1870_v1  ;;  %2590 = vmatprep.mubr.msk.f32.mxu1 %vm2733_vm1, %v2732_v45 }
 0xf62   :  { %2598 = vmatprep.subr.mxu1 %v2732_v45 }
 0xf64   :  { %2591 = vmatmul.mubr.msk.f32.vlgmr.msra.gmra.mxu1 %vm186_vm2, %v1868_v4 }
 0xf65   :  { %2599 = vmatpush3.msra.mxu1 %v2977_v23  ;;  %2600 = vmatprep.mubr.msk.f32.mxu1 %vm2733_vm1, %v2732_v45 }
0x1020   :  { %v1789_v7 = vpop.f32.mrf.mxu1 }
0x1021   :  { %2586 = vmatmul.mubr.msk.f32.vlgmr.msra.gmra.mxu0 %vm186_vm2, %v1789_v7 }
0x1022   :  { %v2582_v9 = vpop.f32.mrf.mxu1  ;;  %2595 = vmatprep.mubr.msk.f32.mxu0 %vm2733_vm1, %v2732_v45 }
0x1023   :  { %v52_v9 = vld [vmem:[%s3137_s2 + $0x78] sm:$0xff] }
0x1024   :  { %v1941_v14 = vpop.f32.mrf.mxu1  ;;  %2614 = vmatprep.subr.mxu1 %v52_v9 }
0x1025   :  { %v1945_v16 = vsel %vm186_vm2, %v1941_v14, -inf }
0x1026   :  { %1946 = vmax.xlane.f32.xlu1 %v1945_v16  ;;  %v2592_v17 = vpop.f32.mrf.mxu1  ;;  %v50_v16 = vld [vmem:[%s3137_s2 + $0x68] sm:$0xff] }
0x1027   :  { %v49_v17 = vld [vmem:[%s3137_s2 + $0x60] sm:$0xff] }
0x102a   :  { %2115 = vadd.xlane.f32.xlu1 %v2114_v18  ;;  %v48_v18 = vld [vmem:[%s3137_s2 + $0x58] sm:$0xff] }
0x102e   :  { %2125 = vadd.xlane.f32.xlu1 %v2124_v20  ;;  %v46_v20 = vld [vmem:[%s3137_s2 + $0x48] sm:$0xff] }
0x10af   :  { %v1947_v21 = vpop.xlane.xlu1 %1946 }
0x10b0   :  { %v1948_v45 = vsub.f32 %v1941_v14, %v1947_v21  ;;  %v51_v14 = vld [vmem:[%s3137_s2 + $0x70] sm:$0xff]  ;;  %v45_v21 = vld [vmem:[%s3137_s2 + $0x40] sm:$0xff] }
0x10b2   :  { %v1949_v22 = vmul.f32 1.442695, %v1948_v45  ;;  %v44_v45 = vld [vmem:[%s3137_s2 + $0x38] sm:$0xff] }
0x10b3   :  { %v2116_v25 = vpop.xlane.xlu1 %2115 }
0x10b4   :  { %2698 = vpow2.f32 %v1949_v22  ;;  %v2120_v27 = vmul.f32 0.03125, %v2116_v25  ;;  %v43_v22 = vld [vmem:[%s3137_s2 + $0x30] sm:$0xff]  ;;  %v37_v25 = vld [vmem:[%s3137_s2] sm:$0xff] }
0x10b6   :  { %v2132_v30 = vmul.f32 %v2120_v27, %v2120_v27 }
0x10b7   :  { %v2126_v26 = vpop.xlane.xlu1 %2125 }
0x10b8   :  { %v2130_v28 = vmul.f32 0.03125, %v2126_v26  ;;  %v2158_v26 = vsub.s32 6, %v2824_v29 }
0x10ba   :  { %v2134_v32 = vsub.f32 %v2130_v28, %v2132_v30 }
0x10bc   :  { %v2138_v33 = vadd.f32 1e-05, %v2134_v32 }
0x10be   :  { %2700 = vrsqrt.f32 %v2138_v33 }
0x10c1   :  { %v2699_v2 = vpop.eup %2698 }
0x10c2   :  { %v1951_v23 = vsel %vm186_vm2, %v2699_v2, 0.0 }
0x10c3   :  { %1952 = vadd.xlane.f32.xlu0 %v1951_v23  ;;  %v41_v23 = vld [vmem:[%s3137_s2 + $0x20] sm:$0xff] }
0x10cb   :  { %v2701_v38 = vpop.eup %2700 }
0x10d9   :  { %1956 = vrot.lane.b32.xlu0 %v2847_v49, %s2745_s12  ;;  %v2136_v49 = vsub.f32 %v3035_v15, %v2120_v27  ;;  %v2159_v27 = vrot.slane %v2830_v31, %v2158_v26 }
0x10db   :  { %v2142_v13 = vmul.f32 %v2701_v38, %v2136_v49 }
0x10dd   :  { %v2148_v41 = vmul.f32 %v2147_v39, %v2142_v13 }
0x10df   :  { %v2154_v46 = vadd.f32 %v2153_v42, %v2148_v41 }
0x10e1   :  { %v1862_v12 = vpop.f32.mrf.mxu0 }
0x10e2   :  { %v1866_v24 = vadd.f32 %v1862_v12, %v1625_v52  ;;  %v40_v12 = vld [vmem:[%s3137_s2 + $0x18] sm:$0xff] }
0x10e3   :  { %v2587_v10 = vpop.f32.mrf.mxu0 }
0x10e4   :  { %v38_v10 = vld [vmem:[%s3137_s2 + $0x8] sm:$0xff] }
0x114c   :  { %v1953_v34 = vpop.xlane.xlu0 %1952 }
0x114d   :  { %2702 = vrcp.f32 %v1953_v34 }
0x1150   :  { %v1957_v35 = vpop.permute.xlu0 %1956 }
0x1151   :  { %2594 = vmatpush3.msra.mxu0 %v1957_v35 }
0x1152   :  { %2603 = vmatprep.subr.mxu0 %v36_v57 }
0x115a   :  { %v2703_v43 = vpop.eup %2702 }
0x115b   :  { %v1955_v44 = vmul.f32 %v2703_v43, %v2699_v2  ;;  %v42_v2 = vld [vmem:[%s3137_s2 + $0x28] sm:$0xff] }
0x115d   :  { %2596 = vmatmul.mubr.msk.f32.vlgmr.msra.gmra.mxu0 %vm186_vm2, %v1955_v44 }
0x115e   :  { %2611 = vmatprep.mubr.msk.f32.mxu0 %vm24_vm0, %v2154_v46  ;;  %2604 = vmatpush3.msra.mxu0 %v36_v57 }
0x115f   :  { %2605 = vmatprep.subr.mxu0 %v34_v58 }
0x1160   :  { %2606 = vmatpush3.msra.mxu0 %v34_v58 }
0x121d   :  { %v2028_v37 = vpop.f32.mrf.mxu0 }
0x121e   :  { %2601 = vmatmul.mubr.msk.f32.vlgmr.msra.gmra.mxu1 %vm186_vm2, %v2028_v37 }
0x121f   :  { %v2597_v47 = vpop.f32.mrf.mxu0  ;;  %2615 = vmatpush3.msra.mxu1 %v52_v9 }
0x1220   :  { %2616 = vmatprep.subr.mxu1 %v51_v14 }
0x1221   :  { %2617 = vmatpush3.msra.mxu1 %v51_v14 }
0x1222   :  { %2618 = vmatprep.subr.mxu1 %v50_v16 }
0x1223   :  { %2619 = vmatpush3.msra.mxu1 %v50_v16 }
0x1224   :  { %2620 = vmatprep.subr.mxu1 %v49_v17 }
0x1225   :  { %2621 = vmatpush3.msra.mxu1 %v49_v17 }
0x1226   :  { %2622 = vmatprep.subr.mxu1 %v48_v18 }
0x1227   :  { %2623 = vmatpush3.msra.mxu1 %v48_v18 }
0x1228   :  { %2624 = vmatprep.subr.mxu1 %v47_v19 }
0x1229   :  { %2625 = vmatpush3.msra.mxu1 %v47_v19 }
0x122a   :  { %2626 = vmatprep.subr.mxu1 %v46_v20 }
0x122b   :  { %2627 = vmatpush3.msra.mxu1 %v46_v20 }
0x122c   :  { %2628 = vmatprep.subr.mxu1 %v45_v21 }
0x122d   :  { %2629 = vmatpush3.msra.mxu1 %v45_v21 }
0x122e   :  { %2630 = vmatprep.subr.mxu1 %v44_v45 }
0x122f   :  { %2631 = vmatpush3.msra.mxu1 %v44_v45 }
0x1230   :  { %2632 = vmatprep.subr.mxu1 %v43_v22 }
0x1231   :  { %2633 = vmatpush3.msra.mxu1 %v43_v22 }
0x1232   :  { %2634 = vmatprep.subr.mxu1 %v42_v2 }
0x1233   :  { %2635 = vmatpush3.msra.mxu1 %v42_v2 }
0x1234   :  { %2636 = vmatprep.subr.mxu1 %v41_v23 }
0x1235   :  { %2637 = vmatpush3.msra.mxu1 %v41_v23 }
0x1236   :  { %2638 = vmatprep.subr.mxu1 %v40_v12 }
0x1237   :  { %2639 = vmatpush3.msra.mxu1 %v40_v12 }
0x12de   :  { %v2101_v48 = vpop.f32.mrf.mxu1 }
0x12df   :  { %v2105_v50 = vadd.f32 %v2101_v48, %v1866_v24  ;;  %v39_v24 = vld [vmem:[%s3137_s2 + $0x10] sm:$0xff]  ;;  %s2746_s2 = smov [#allocation2]  }
0x12e0   :  { %v2602_v51 = vpop.f32.mrf.mxu1  ;;  %2640 = vmatprep.subr.mxu1 %v39_v24  ;;  %s2347_s22 = sshll.u32 %s2746_s2, 4  ;;  %s2348_s22 = int_to_ptr.vmem [resolvable:$true] %s2347_s22 }
0x12e1   :  { %v2111_v52 = vadd.f32 %v2109_v6, %v2105_v50  ;;  %2641 = vmatpush3.msra.mxu1 %v39_v24  ;;  %s2710_s23 = scalar_lea.vmem %s2348_s22, 256  ;;  %p2715_p1 = scmp.lt.s32.totalorder %s2348_s22, %s2348_s22 }
0x12e2   :  { %2642 = vmatprep.subr.mxu1 %v38_v10  ;;  %p2711_p0 = scmp.ne.s32.totalorder %s2348_s22, %s2710_s23  ;;  %p2716_p2 = scmp.lt.s32.totalorder %s2710_s23, %s2710_s23 }
0x12e3   :  { %v3055_v53 = vadd.f32 %v2111_v52, %v2784_v3  ;;  %v32_v3 = vld [vmem:[%s3136_s1 + $0x18] sm:$0xff]  ;;  %2643 = vmatpush3.msra.mxu1 %v38_v10  ;;  %v2261_v52 = vsub.s32 5, %v2824_v29 }
0x12e4   :  { %2607 = vmatprep.subr.mxu0 %v32_v3  ;;  %2644 = vmatprep.subr.mxu1 %v37_v25  ;;  %p2717_p3 = por %p2716_p2, %p2715_p1 }
0x12e5   :  { %v2117_v54 = vsel %vm24_vm0, %v3055_v53, 0.0  ;;  %v2123_v55 = vmul.f32 %v3055_v53, %v3055_v53  ;;  %2608 = vmatpush3.msra.mxu0 %v32_v3  ;;  %2645 = vmatpush3.msra.mxu1 %v37_v25 }
0x12e6   :  { %2118 = vadd.xlane.f32.xlu1 %v2117_v54  ;;  %2609 = vmatprep.subr.mxu0 %v30_v11  ;;  %v2262_v54 = vrot.slane %v2830_v31, %v2261_v52  ;;  %p2718_p4 = pnand %p2717_p3, %p2711_p0 }
0x12e7   :  { %v2127_v56 = vsel %vm24_vm0, %v2123_v55, 0.0  ;;  %2610 = vmatpush3.msra.mxu0 %v30_v11 }
0x12ea   :  { %2128 = vadd.xlane.f32.xlu1 %v2127_v56 }
0x136f   :  { %v2119_v59 = vpop.xlane.xlu1 %2118 }
0x1370   :  { %v2121_v60 = vmul.f32 0.03125, %v2119_v59 }
0x1372   :  { %v2133_v62 = vmul.f32 %v2121_v60, %v2121_v60  ;;  %v2137_v4 = vsub.f32 %v3055_v53, %v2121_v60 }
0x1373   :  { %v2129_v61 = vpop.xlane.xlu1 %2128 }
0x1374   :  { %v2131_v63 = vmul.f32 0.03125, %v2129_v61 }
0x1376   :  { %v2135_v0 = vsub.f32 %v2131_v63, %v2133_v62 }
0x1378   :  { %v2139_v1 = vadd.f32 1e-05, %v2135_v0 }
0x137a   :  { %2704 = vrsqrt.f32 %v2139_v1 }
0x1387   :  { %v2705_v5 = vpop.eup %2704 }
0x1388   :  { %v2143_v6 = vmul.f32 %v2705_v5, %v2137_v4 }
0x138a   :  { %v2149_v7 = vmul.f32 %v2147_v39, %v2143_v6 }
0x138c   :  { %v2155_v8 = vadd.f32 %v2153_v42, %v2149_v7 }
0x138e   :  { %2612 = vmatmul.mubr.msk.f32.vlgmr.msra.gmra.mxu0 %vm24_vm0, %v2155_v8 }
0x144e   :  { %v2613_v28 = vpop.f32.mrf.mxu0 }
0x144f   :  { %v2238_v30 = vadd.f32 %v2613_v28, %v2159_v27 }
0x1450   :  { %v2232_v32 = vpop.f32.mrf.mxu0 }
0x1451   :  { %v2244_v33 = vmul.f32 0.044715, %v2238_v30  ;;  %v2233_v34 = vadd.f32 %v2232_v32, %v2159_v27  ;;  %v2242_v48 = vmul.f32 0.5, %v2238_v30 }
0x1453   :  { %v2246_v35 = vmul.f32 %v2244_v33, %v2238_v30  ;;  %v2243_v36 = vmul.f32 0.044715, %v2233_v34  ;;  %v2241_v37 = vmul.f32 0.5, %v2233_v34 }
0x1455   :  { %v2248_v38 = vmul.f32 %v2246_v35, %v2238_v30  ;;  %v2245_v49 = vmul.f32 %v2243_v36, %v2233_v34 }
0x1457   :  { %v2250_v13 = vadd.f32 %v2248_v38, %v2238_v30  ;;  %v2247_v39 = vmul.f32 %v2245_v49, %v2233_v34 }
0x1459   :  { %v2249_v40 = vadd.f32 %v2247_v39, %v2233_v34  ;;  %v2252_v41 = vmul.f32 0.7978846, %v2250_v13 }
0x145b   :  { %v2251_v42 = vmul.f32 0.7978846, %v2249_v40  ;;  %2706 = vtanh.f32 %v2252_v41 }
0x145d   :  { %2708 = vtanh.f32 %v2251_v42 }
0x1468   :  { %v2707_v43 = vpop.eup %2706 }
0x1469   :  { %v2256_v46 = vadd.f32 1.0, %v2707_v43 }
0x146a   :  { %v2709_v44 = vpop.eup %2708 }
0x146b   :  { %v2255_v47 = vadd.f32 1.0, %v2709_v44  ;;  %v2258_v51 = vmul.f32 %v2256_v46, %v2242_v48 }
0x146d   :  { %v2257_v50 = vmul.f32 %v2255_v47, %v2241_v37 }
0x146f   :  { %2646 = vmatprep.mubr.f32.mxu1 %v2257_v50 }
0x1470   :  { %2647 = vmatmul.mubr.f32.vlgmr.msra.gmra.mxu1 %v2258_v51 }
0x1530   :  { %v2648_v55 = vpop.f32.mrf.mxu1 }
0x1531   :  { %v2335_v56 = vadd.f32 %v2648_v55, %v2262_v54 }
0x1532   :  { %v2329_v57 = vpop.f32.mrf.mxu1 }
0x1533   :  { %v2339_v58 = vadd.f32 %v2335_v56, %v3055_v53  ;;  %v2330_v3 = vadd.f32 %v2329_v57, %v2262_v54 }
0x1535   :  { %2341 = vst.msk [vmem:[#allocation2 + $0x8] sm:$0xff] %vm24_vm0, %v2339_v58  ;;  %v2338_v11 = vadd.f32 %v2330_v3, %v3035_v15 }
0x1537   :  { %2340 = vst.msk [vmem:[#allocation2] sm:$0xff] %vm24_vm0, %v2338_v11 }
0x1538   :  { %2721 = shalt.err (!%p2718_p4)
}
0x1539   :  { %s2747_s24 = smov 128   ;;  %s2748_s25 = smov 8  }
0x153a   :  { %2353 = dma.vmem_to_hbm [thread:$0]  %s2348_s22, 256, %s3139_s4, [#allocation3], %s2747_s24, %s2747_s24, %s2748_s25  }
0x153b   :  { %2730 = dma.done.wait [#allocation3], 256  }
0x153c   :  { %2731 = vsyncadd [#allocation3], 4294967040 }
0x153d   :  { %2357 = vsyncpa [#allocation3], 1 }

</bundles_post_ra>
